<compile_context>
chip_gen: v7x
topology: tpu7x:2x2x1
jax: 0.10.0
libtpu: 0.0.40
codegen_flags: <defaults>
</compile_context>

<pallas_src>
import functools

import jax
import jax.numpy as jnp
from jax.experimental import pallas as pl
from jax.experimental.pallas import tpu as pltpu


_VMEM_LIMIT = 48 * 1024 * 1024   # fits v7x's 64 MiB physical VMEM with headroom


def _adaptive_attention_kernel(
    aw_ref,                                   # SMEM (1,) adaptive weight (scalar path)
    x_ref,                                    # (TB, S, F) f32, batch-tiled
    tw1_ref, tb1_ref, tw2_ref, tb2_ref,       # temporal_attention Linear(S->S/2), Linear(S/2->S)
    fw1_ref, fb1_ref, fw2_ref, fb2_ref,       # feature_attention  Linear(F->F/2), Linear(F/2->F)
    pw1_ref, pb1_ref, pw2_ref, pb2_ref,       # feature_proj Linear(F->64), Linear(64->32)
    out_ref,                                  # (TB, S, F) or (TB, 1, S*F) when flat_out
    proj_ref,                                 # (TB, 1, 32)
    *, flat_out,
):
    x = x_ref[...]                                          # (TB, S, F)
    TB, S, F = x.shape

    # ---- temporal attention: softmax(W2 @ relu(W1 @ mean_F(x) + b1) + b2) ----
    # 1/F is pre-folded into tw1, so a plain sum is the mean's matmul input.
    t_in = jnp.sum(x, axis=2)                               # (TB, S)
    t_h = jnp.maximum(
        jnp.dot(t_in, tw1_ref[...], preferred_element_type=jnp.float32)
        + tb1_ref[...], 0.0)                                # (TB, S//2)
    t_logits = (jnp.dot(t_h, tw2_ref[...], preferred_element_type=jnp.float32)
                + tb2_ref[...])                             # (TB, S)
    t_logits = t_logits - jnp.max(t_logits, axis=-1, keepdims=True)
    t_exp = jnp.exp(t_logits)
    temporal_w = t_exp * pl.reciprocal(
        jnp.sum(t_exp, axis=-1, keepdims=True))             # (TB, S) softmax over seq

    # ---- feature attention: sigmoid(W2 @ relu(W1 @ mean_S(x) + b1) + b2) ----
    # 1/S is pre-folded into fw1.
    f_in = jnp.sum(x, axis=1)                               # (TB, F)
    f_h = jnp.maximum(
        jnp.dot(f_in, fw1_ref[...], preferred_element_type=jnp.float32)
        + fb1_ref[...], 0.0)                                # (TB, F//2)
    feature_w = jax.nn.sigmoid(
        jnp.dot(f_h, fw2_ref[...], preferred_element_type=jnp.float32)
        + fb2_ref[...])                                     # (TB, F)

    # ---- fused adaptive blend ----
    # w = a*tw[:,:,None] + (1-a)*fw[:,None,:] (scaling done on the small 2-D
    # tensors), then a single full-size multiply with x.
    a = aw_ref[0]
    blend = ((a * temporal_w)[:, :, None]
             + ((1.0 - a) * feature_w)[:, None, :])         # (TB, S, F)
    output = x * blend
    if flat_out:
        # Lane-dense store: trailing dim S*F instead of F (< 128 lanes).
        out_ref[...] = output.reshape(TB, 1, S * F)
    else:
        out_ref[...] = output

    # ---- projection head on the global (seq-mean) feature ----
    # 1/S is pre-folded into pw1.
    # TODO(synk): optional closed form g = a*einsum('bs,bsf->bf',tw,x) + (1-a)*fw*f_in
    # would move this reduce onto the idle MXU; skipped as a secondary micro-opt.
    g = jnp.sum(output, axis=1)                             # (TB, F)
    p1 = jnp.maximum(
        jnp.dot(g, pw1_ref[...], preferred_element_type=jnp.float32)
        + pb1_ref[...], 0.0)                                # (TB, 64)
    p2 = jnp.maximum(
        jnp.dot(p1, pw2_ref[...], preferred_element_type=jnp.float32)
        + pb2_ref[...], 0.0)                                # (TB, 32)
    proj_ref[...] = p2[:, None, :]                          # (TB, 1, 32)


def _choose_batch_tile(B, S, F, weights_bytes, vmem_limit_bytes=_VMEM_LIMIT):
    """Batch-tile size accounting for everything that actually lives in VMEM."""
    row_bytes = S * F * 4                     # one f32 batch row of x (== out)
    # Per grid step: x tile + out tile (double-buffered => 2x each) plus ~3
    # tile-sized in-kernel temporaries (loaded x, blend, output-before-store).
    per_row = 7 * row_bytes
    # Resident weights have a constant block index (DMA'd once) but the
    # pipeline still allocates 2 buffers each -> count them at 2x.
    # TODO(synk): single-buffer them via pipeline_mode=pl.Buffered(1) once that
    # path is verified on the target jax/Mosaic version (halves weight VMEM).
    budget = vmem_limit_bytes - 2 * weights_bytes - (2 << 20)   # 2 MiB headroom
    tb = max(1, budget // per_row)            # no round-up: never exceed budget
    # Prefer >= ~4 grid steps so Pallas can overlap prefetch(i+1)/writeback(i-1)
    # with compute(i) and the "parallel" batch axis splits evenly across v7x's
    # two TensorCores -- but never shrink a tile below ~512 KiB of x.
    min_rows = max(1, (512 * 1024) // row_bytes)
    tb = min(tb, max(min_rows, pl.cdiv(B, 4)))
    return max(1, min(tb, B))


def adaptive_attention(x, params):
    """Forward pass of AdaptiveAttentionMechanism. Returns (output, projected_feature)."""
    B, S, F = x.shape
    P2 = params["pw2"].shape[1]               # projection output width (32)

    # Fold the mean scales into the first-layer weights (tiny one-time scales,
    # removes per-tile VPU scale passes inside the kernel).
    weight_args = (
        params["tw1"] * (1.0 / F), params["tb1"], params["tw2"], params["tb2"],
        params["fw1"] * (1.0 / S), params["fb1"], params["fw2"], params["fb2"],
        params["pw1"] * (1.0 / S), params["pb1"], params["pw2"], params["pb2"],
    )
    weights_bytes = sum(int(a.size) * a.dtype.itemsize for a in weight_args)
    TB = _choose_batch_tile(B, S, F, weights_bytes)
    grid = (pl.cdiv(B, TB),)

    def resident_spec(a):
        # Whole-array block with a constant index map -> stays resident in VMEM
        # across all batch tiles (single DMA, no re-copy).
        return pl.BlockSpec(a.shape, lambda b, n=a.ndim: (0,) * n)

    def build(flat_out):
        in_specs = (
            [pl.BlockSpec(memory_space=pltpu.MemorySpace.SMEM)]      # adaptive weight scalar
            + [pl.BlockSpec((TB, S, F), lambda b: (b, 0, 0))]        # x, batch-tiled
            + [resident_spec(a) for a in weight_args]
        )
        if flat_out:
            # Lane-dense main output when F < 128: last two dims (1, S*F) are
            # full-extent, so TB is an unconstrained leading dim.
            out_spec0 = pl.BlockSpec((TB, 1, S * F), lambda b: (b, 0, 0))
            out_shape0 = jax.ShapeDtypeStruct((B, 1, S * F), jnp.float32)
        else:
            out_spec0 = pl.BlockSpec((TB, S, F), lambda b: (b, 0, 0))
            out_shape0 = jax.ShapeDtypeStruct((B, S, F), jnp.float32)
        out_specs = (
            out_spec0,
            # (TB, 1, P2): last two dims full-extent -> no sublane constraint on TB.
            pl.BlockSpec((TB, 1, P2), lambda b: (b, 0, 0)),
        )
        out_shape = (out_shape0, jax.ShapeDtypeStruct((B, 1, P2), jnp.float32))
        return pl.pallas_call(
            functools.partial(_adaptive_attention_kernel, flat_out=flat_out),
            grid=grid,
            in_specs=in_specs,
            out_specs=out_specs,
            out_shape=out_shape,
            compiler_params=pltpu.CompilerParams(
                dimension_semantics=("parallel",),       # batch tiles are independent
                vmem_limit_bytes=_VMEM_LIMIT,
            ),
        )

    args = (params["aw"], x, *weight_args)
    flat_out = (F % 128) != 0                 # F already lane-dense -> keep 3-D layout
    if flat_out:
        try:
            out_flat, proj = build(True)(*args)
            out = out_flat.reshape(B, S, F)
        except Exception:
            # TODO(synk): this Mosaic version rejected the minor-dim-collapse
            # reshape; fall back to the (masked-store) 3-D output layout.
            out, proj = build(False)(*args)
    else:
        out, proj = build(False)(*args)
    return out, proj.reshape(B, P2)


def adaptive_attention_ref(x, p):
    """Pure-JAX reference mirroring the PyTorch forward."""
    tw = jax.nn.softmax(
        jnp.maximum(x.mean(2) @ p["tw1"] + p["tb1"], 0.0) @ p["tw2"] + p["tb2"], axis=-1)
    fw = jax.nn.sigmoid(
        jnp.maximum(x.mean(1) @ p["fw1"] + p["fb1"], 0.0) @ p["fw2"] + p["fb2"])
    a = p["aw"][0]
    out = a * (x * tw[:, :, None]) + (1.0 - a) * (x * fw[:, None, :])
    g = out.mean(1)
    proj = jnp.maximum(jnp.maximum(g @ p["pw1"] + p["pb1"], 0.0) @ p["pw2"] + p["pb2"], 0.0)
    return out, proj


def init_params(key, seq_len, feature_dim):
    ks = jax.random.split(key, 12)
    n = lambda k, s: (0.1 * jax.random.normal(k, s)).astype(jnp.float32)
    return {
        # temporal_attention: Linear(S, S//2), Linear(S//2, S)
        "tw1": n(ks[0], (seq_len, seq_len // 2)),
        "tb1": n(ks[1], (1, seq_len // 2)),
        "tw2": n(ks[2], (seq_len // 2, seq_len)),
        "tb2": n(ks[3], (1, seq_len)),
        # feature_attention: Linear(F, F//2), Linear(F//2, F)
        "fw1": n(ks[4], (feature_dim, feature_dim // 2)),
        "fb1": n(ks[5], (1, feature_dim // 2)),
        "fw2": n(ks[6], (feature_dim // 2, feature_dim)),
        "fb2": n(ks[7], (1, feature_dim)),
        # adaptive_weight = torch.ones(1)
        "aw": jnp.ones((1,), jnp.float32),
        # feature_proj: Linear(F, 64), Linear(64, 32)
        "pw1": n(ks[8], (feature_dim, 64)),
        "pb1": n(ks[9], (1, 64)),
        "pw2": n(ks[10], (64, 32)),
        "pb2": n(ks[11], (1, 32)),
    }


if __name__ == "__main__":
    B, S, F = 2, 8, 32  # batch, seq_len, feature_dim

    key = jax.random.PRNGKey(0)
    kx, kp = jax.random.split(key)
    x = jax.random.normal(kx, (B, S, F), dtype=jnp.float32)
    params = init_params(kp, S, F)

    # aw=0.65 exercises both blend branches (module init is ones(1), which zeroes
    # the feature branch); also check the module-default value.
    for aw_val in (0.65, 1.0):
        p = dict(params, aw=jnp.full((1,), aw_val, jnp.float32))
        out, proj = adaptive_attention(x, p)
        out, proj = jax.block_until_ready((out, proj))

        out_ref, proj_ref = adaptive_attention_ref(x, p)
        assert out.shape == (B, S, F) and proj.shape == (B, 32)
        assert jnp.allclose(out, out_ref, atol=1e-5, rtol=1e-5)
        assert jnp.allclose(proj, proj_ref, atol=1e-5, rtol=1e-5)

    print("KERNEL_OK")
</pallas_src>

<mosaic_0001>
module attributes {stable_mosaic.version = 11 : i64} {
  func.func @_adaptive_attention_kernel(%arg0: i32, %arg1: memref<1xf32, #tpu.memory_space<smem>>, %arg2: memref<2x8x32xf32, #tpu.memory_space<vmem>>, %arg3: memref<8x4xf32, #tpu.memory_space<vmem>>, %arg4: memref<1x4xf32, #tpu.memory_space<vmem>>, %arg5: memref<4x8xf32, #tpu.memory_space<vmem>>, %arg6: memref<1x8xf32, #tpu.memory_space<vmem>>, %arg7: memref<32x16xf32, #tpu.memory_space<vmem>>, %arg8: memref<1x16xf32, #tpu.memory_space<vmem>>, %arg9: memref<16x32xf32, #tpu.memory_space<vmem>>, %arg10: memref<1x32xf32, #tpu.memory_space<vmem>>, %arg11: memref<32x64xf32, #tpu.memory_space<vmem>>, %arg12: memref<1x64xf32, #tpu.memory_space<vmem>>, %arg13: memref<64x32xf32, #tpu.memory_space<vmem>>, %arg14: memref<1x32xf32, #tpu.memory_space<vmem>>, %arg15: memref<2x1x256xf32, #tpu.memory_space<vmem>>, %arg16: memref<2x1x32xf32, #tpu.memory_space<vmem>>) attributes {dimension_semantics = [#tpu.dimension_semantics<parallel>], iteration_bounds = array<i64: 1>, scalar_prefetch = 0 : i64, scratch_operands = 0 : i64, tpu.core_type = #tpu.core_type<tc>, window_params = [{transform_indices = @transform_0, window_bounds = array<i64: 1>}, {transform_indices = @transform_1, window_bounds = array<i64: 2, 8, 32>}, {pipeline_mode = #tpu.pipeline_mode<synchronous>, transform_indices = @transform_2, window_bounds = array<i64: 8, 4>}, {pipeline_mode = #tpu.pipeline_mode<synchronous>, transform_indices = @transform_3, window_bounds = array<i64: 1, 4>}, {pipeline_mode = #tpu.pipeline_mode<synchronous>, transform_indices = @transform_4, window_bounds = array<i64: 4, 8>}, {pipeline_mode = #tpu.pipeline_mode<synchronous>, transform_indices = @transform_5, window_bounds = array<i64: 1, 8>}, {pipeline_mode = #tpu.pipeline_mode<synchronous>, transform_indices = @transform_6, window_bounds = array<i64: 32, 16>}, {pipeline_mode = #tpu.pipeline_mode<synchronous>, transform_indices = @transform_7, window_bounds = array<i64: 1, 16>}, {pipeline_mode = #tpu.pipeline_mode<synchronous>, transform_indices = @transform_8, window_bounds = array<i64: 16, 32>}, {pipeline_mode = #tpu.pipeline_mode<synchronous>, transform_indices = @transform_9, window_bounds = array<i64: 1, 32>}, {pipeline_mode = #tpu.pipeline_mode<synchronous>, transform_indices = @transform_10, window_bounds = array<i64: 32, 64>}, {pipeline_mode = #tpu.pipeline_mode<synchronous>, transform_indices = @transform_11, window_bounds = array<i64: 1, 64>}, {pipeline_mode = #tpu.pipeline_mode<synchronous>, transform_indices = @transform_12, window_bounds = array<i64: 64, 32>}, {pipeline_mode = #tpu.pipeline_mode<synchronous>, transform_indices = @transform_13, window_bounds = array<i64: 1, 32>}, {transform_indices = @transform_14, window_bounds = array<i64: 2, 1, 256>}, {transform_indices = @transform_15, window_bounds = array<i64: 2, 1, 32>}]} {
    %c0 = arith.constant 0 : index
    %c0_0 = arith.constant 0 : index
    %c0_1 = arith.constant 0 : index
    %0 = vector.load %arg2[%c0, %c0_0, %c0_1] : memref<2x8x32xf32, #tpu.memory_space<vmem>>, vector<2x8x32xf32>
    %cst = arith.constant dense<0.000000e+00> : vector<2x8xf32>
    %1 = vector.multi_reduction <add>, %0, %cst [2] : vector<2x8x32xf32> to vector<2x8xf32>
    %c0_2 = arith.constant 0 : index
    %c0_3 = arith.constant 0 : index
    %2 = vector.load %arg3[%c0_2, %c0_3] : memref<8x4xf32, #tpu.memory_space<vmem>>, vector<8x4xf32>
    %cst_4 = arith.constant dense<0.000000e+00> : vector<2x4xf32>
    %3 = tpu.matmul %1, %2, %cst_4 {dimension_numbers = #tpu.dot_dimension_numbers<[1], [0], [0], [1], [0, 0, 1, 1], [], []>} : vector<2x8xf32>, vector<8x4xf32>, vector<2x4xf32> -> vector<2x4xf32>
    %c0_5 = arith.constant 0 : index
    %c0_6 = arith.constant 0 : index
    %4 = vector.load %arg4[%c0_5, %c0_6] : memref<1x4xf32, #tpu.memory_space<vmem>>, vector<1x4xf32>
    %5 = vector.broadcast %4 : vector<1x4xf32> to vector<2x4xf32>
    %6 = arith.addf %3, %5 : vector<2x4xf32>
    %cst_7 = arith.constant 0.000000e+00 : f32
    %7 = vector.broadcast %cst_7 : f32 to vector<2x4xf32>
    %8 = arith.maximumf %6, %7 : vector<2x4xf32>
    %c0_8 = arith.constant 0 : index
    %c0_9 = arith.constant 0 : index
    %9 = vector.load %arg5[%c0_8, %c0_9] : memref<4x8xf32, #tpu.memory_space<vmem>>, vector<4x8xf32>
    %cst_10 = arith.constant dense<0.000000e+00> : vector<2x8xf32>
    %10 = tpu.matmul %8, %9, %cst_10 {dimension_numbers = #tpu.dot_dimension_numbers<[1], [0], [0], [1], [0, 0, 1, 1], [], []>} : vector<2x4xf32>, vector<4x8xf32>, vector<2x8xf32> -> vector<2x8xf32>
    %c0_11 = arith.constant 0 : index
    %c0_12 = arith.constant 0 : index
    %11 = vector.load %arg6[%c0_11, %c0_12] : memref<1x8xf32, #tpu.memory_space<vmem>>, vector<1x8xf32>
    %12 = vector.broadcast %11 : vector<1x8xf32> to vector<2x8xf32>
    %13 = arith.addf %10, %12 : vector<2x8xf32>
    %cst_13 = arith.constant dense<0xFF800000> : vector<2xf32>
    %14 = vector.multi_reduction <maximumf>, %13, %cst_13 [1] : vector<2x8xf32> to vector<2xf32>
    %15 = vector.shape_cast %14 : vector<2xf32> to vector<2x1xf32>
    %16 = vector.broadcast %15 : vector<2x1xf32> to vector<2x8xf32>
    %17 = arith.subf %13, %16 : vector<2x8xf32>
    %18 = math.exp %17 : vector<2x8xf32>
    %cst_14 = arith.constant dense<0.000000e+00> : vector<2xf32>
    %19 = vector.multi_reduction <add>, %18, %cst_14 [1] : vector<2x8xf32> to vector<2xf32>
    %20 = vector.shape_cast %19 : vector<2xf32> to vector<2x1xf32>
    %21 = tpu.reciprocal %20 : vector<2x1xf32> -> vector<2x1xf32>
    %22 = vector.broadcast %21 : vector<2x1xf32> to vector<2x8xf32>
    %23 = arith.mulf %18, %22 : vector<2x8xf32>
    %cst_15 = arith.constant dense<0.000000e+00> : vector<2x32xf32>
    %24 = vector.multi_reduction <add>, %0, %cst_15 [1] : vector<2x8x32xf32> to vector<2x32xf32>
    %c0_16 = arith.constant 0 : index
    %c0_17 = arith.constant 0 : index
    %25 = vector.load %arg7[%c0_16, %c0_17] : memref<32x16xf32, #tpu.memory_space<vmem>>, vector<32x16xf32>
    %cst_18 = arith.constant dense<0.000000e+00> : vector<2x16xf32>
    %26 = tpu.matmul %24, %25, %cst_18 {dimension_numbers = #tpu.dot_dimension_numbers<[1], [0], [0], [1], [0, 0, 1, 1], [], []>} : vector<2x32xf32>, vector<32x16xf32>, vector<2x16xf32> -> vector<2x16xf32>
    %c0_19 = arith.constant 0 : index
    %c0_20 = arith.constant 0 : index
    %27 = vector.load %arg8[%c0_19, %c0_20] : memref<1x16xf32, #tpu.memory_space<vmem>>, vector<1x16xf32>
    %28 = vector.broadcast %27 : vector<1x16xf32> to vector<2x16xf32>
    %29 = arith.addf %26, %28 : vector<2x16xf32>
    %cst_21 = arith.constant 0.000000e+00 : f32
    %30 = vector.broadcast %cst_21 : f32 to vector<2x16xf32>
    %31 = arith.maximumf %29, %30 : vector<2x16xf32>
    %c0_22 = arith.constant 0 : index
    %c0_23 = arith.constant 0 : index
    %32 = vector.load %arg9[%c0_22, %c0_23] : memref<16x32xf32, #tpu.memory_space<vmem>>, vector<16x32xf32>
    %cst_24 = arith.constant dense<0.000000e+00> : vector<2x32xf32>
    %33 = tpu.matmul %31, %32, %cst_24 {dimension_numbers = #tpu.dot_dimension_numbers<[1], [0], [0], [1], [0, 0, 1, 1], [], []>} : vector<2x16xf32>, vector<16x32xf32>, vector<2x32xf32> -> vector<2x32xf32>
    %c0_25 = arith.constant 0 : index
    %c0_26 = arith.constant 0 : index
    %34 = vector.load %arg10[%c0_25, %c0_26] : memref<1x32xf32, #tpu.memory_space<vmem>>, vector<1x32xf32>
    %35 = vector.broadcast %34 : vector<1x32xf32> to vector<2x32xf32>
    %36 = arith.addf %33, %35 : vector<2x32xf32>
    %37 = arith.negf %36 : vector<2x32xf32>
    %38 = math.exp %37 : vector<2x32xf32>
    %cst_27 = arith.constant 1.000000e+00 : f32
    %39 = vector.broadcast %cst_27 : f32 to vector<2x32xf32>
    %40 = arith.addf %39, %38 : vector<2x32xf32>
    %41 = arith.divf %39, %40 : vector<2x32xf32>
    %c0_28 = arith.constant 0 : index
    %42 = memref.load %arg1[%c0_28] : memref<1xf32, #tpu.memory_space<smem>>
    %43 = vector.broadcast %42 : f32 to vector<2x8xf32>
    %44 = arith.mulf %43, %23 : vector<2x8xf32>
    %45 = vector.shape_cast %44 : vector<2x8xf32> to vector<2x8x1xf32>
    %cst_29 = arith.constant 1.000000e+00 : f32
    %46 = arith.subf %cst_29, %42 : f32
    %47 = vector.broadcast %46 : f32 to vector<2x32xf32>
    %48 = arith.mulf %47, %41 : vector<2x32xf32>
    %49 = vector.shape_cast %48 : vector<2x32xf32> to vector<2x1x32xf32>
    %50 = vector.broadcast %45 : vector<2x8x1xf32> to vector<2x8x32xf32>
    %51 = vector.broadcast %49 : vector<2x1x32xf32> to vector<2x8x32xf32>
    %52 = arith.addf %50, %51 : vector<2x8x32xf32>
    %53 = arith.mulf %0, %52 : vector<2x8x32xf32>
    %54 = vector.shape_cast %53 : vector<2x8x32xf32> to vector<2x1x256xf32>
    %c0_30 = arith.constant 0 : index
    %c0_31 = arith.constant 0 : index
    %c0_32 = arith.constant 0 : index
    %55 = vector.load %arg15[%c0_30, %c0_31, %c0_32] : memref<2x1x256xf32, #tpu.memory_space<vmem>>, vector<2x1x256xf32>
    tpu.vector_store %arg15[%c0_30, %c0_31, %c0_32], %54 {strides = array<i32>} : memref<2x1x256xf32, #tpu.memory_space<vmem>>, vector<2x1x256xf32>,
    %cst_33 = arith.constant dense<0.000000e+00> : vector<2x32xf32>
    %56 = vector.multi_reduction <add>, %53, %cst_33 [1] : vector<2x8x32xf32> to vector<2x32xf32>
    %c0_34 = arith.constant 0 : index
    %c0_35 = arith.constant 0 : index
    %57 = vector.load %arg11[%c0_34, %c0_35] : memref<32x64xf32, #tpu.memory_space<vmem>>, vector<32x64xf32>
    %cst_36 = arith.constant dense<0.000000e+00> : vector<2x64xf32>
    %58 = tpu.matmul %56, %57, %cst_36 {dimension_numbers = #tpu.dot_dimension_numbers<[1], [0], [0], [1], [0, 0, 1, 1], [], []>} : vector<2x32xf32>, vector<32x64xf32>, vector<2x64xf32> -> vector<2x64xf32>
    %c0_37 = arith.constant 0 : index
    %c0_38 = arith.constant 0 : index
    %59 = vector.load %arg12[%c0_37, %c0_38] : memref<1x64xf32, #tpu.memory_space<vmem>>, vector<1x64xf32>
    %60 = vector.broadcast %59 : vector<1x64xf32> to vector<2x64xf32>
    %61 = arith.addf %58, %60 : vector<2x64xf32>
    %cst_39 = arith.constant 0.000000e+00 : f32
    %62 = vector.broadcast %cst_39 : f32 to vector<2x64xf32>
    %63 = arith.maximumf %61, %62 : vector<2x64xf32>
    %c0_40 = arith.constant 0 : index
    %c0_41 = arith.constant 0 : index
    %64 = vector.load %arg13[%c0_40, %c0_41] : memref<64x32xf32, #tpu.memory_space<vmem>>, vector<64x32xf32>
    %cst_42 = arith.constant dense<0.000000e+00> : vector<2x32xf32>
    %65 = tpu.matmul %63, %64, %cst_42 {dimension_numbers = #tpu.dot_dimension_numbers<[1], [0], [0], [1], [0, 0, 1, 1], [], []>} : vector<2x64xf32>, vector<64x32xf32>, vector<2x32xf32> -> vector<2x32xf32>
    %c0_43 = arith.constant 0 : index
    %c0_44 = arith.constant 0 : index
    %66 = vector.load %arg14[%c0_43, %c0_44] : memref<1x32xf32, #tpu.memory_space<vmem>>, vector<1x32xf32>
    %67 = vector.broadcast %66 : vector<1x32xf32> to vector<2x32xf32>
    %68 = arith.addf %65, %67 : vector<2x32xf32>
    %cst_45 = arith.constant 0.000000e+00 : f32
    %69 = vector.broadcast %cst_45 : f32 to vector<2x32xf32>
    %70 = arith.maximumf %68, %69 : vector<2x32xf32>
    %71 = vector.shape_cast %70 : vector<2x32xf32> to vector<2x1x32xf32>
    %c0_46 = arith.constant 0 : index
    %c0_47 = arith.constant 0 : index
    %c0_48 = arith.constant 0 : index
    %72 = vector.load %arg16[%c0_46, %c0_47, %c0_48] : memref<2x1x32xf32, #tpu.memory_space<vmem>>, vector<2x1x32xf32>
    tpu.vector_store %arg16[%c0_46, %c0_47, %c0_48], %71 {strides = array<i32>} : memref<2x1x32xf32, #tpu.memory_space<vmem>>, vector<2x1x32xf32>,
    return
  }
  func.func @transform_0(%arg0: i32) -> i32 {
    %c0_i32 = arith.constant 0 : i32
    %c0_i32_0 = arith.constant 0 : i32
    return %c0_i32 : i32
  }
  func.func @transform_1(%arg0: i32) -> (i32, i32, i32) {
    %c0_i32 = arith.constant 0 : i32
    %c0_i32_0 = arith.constant 0 : i32
    %c0_i32_1 = arith.constant 0 : i32
    return %arg0, %c0_i32, %c0_i32_0 : i32, i32, i32
  }
  func.func @transform_2(%arg0: i32) -> (i32, i32) {
    %c0_i32 = arith.constant 0 : i32
    %c0_i32_0 = arith.constant 0 : i32
    %c0_i32_1 = arith.constant 0 : i32
    return %c0_i32, %c0_i32_0 : i32, i32
  }
  func.func @transform_3(%arg0: i32) -> (i32, i32) {
    %c0_i32 = arith.constant 0 : i32
    %c0_i32_0 = arith.constant 0 : i32
    %c0_i32_1 = arith.constant 0 : i32
    return %c0_i32, %c0_i32_0 : i32, i32
  }
  func.func @transform_4(%arg0: i32) -> (i32, i32) {
    %c0_i32 = arith.constant 0 : i32
    %c0_i32_0 = arith.constant 0 : i32
    %c0_i32_1 = arith.constant 0 : i32
    return %c0_i32, %c0_i32_0 : i32, i32
  }
  func.func @transform_5(%arg0: i32) -> (i32, i32) {
    %c0_i32 = arith.constant 0 : i32
    %c0_i32_0 = arith.constant 0 : i32
    %c0_i32_1 = arith.constant 0 : i32
    return %c0_i32, %c0_i32_0 : i32, i32
  }
  func.func @transform_6(%arg0: i32) -> (i32, i32) {
    %c0_i32 = arith.constant 0 : i32
    %c0_i32_0 = arith.constant 0 : i32
    %c0_i32_1 = arith.constant 0 : i32
    return %c0_i32, %c0_i32_0 : i32, i32
  }
  func.func @transform_7(%arg0: i32) -> (i32, i32) {
    %c0_i32 = arith.constant 0 : i32
    %c0_i32_0 = arith.constant 0 : i32
    %c0_i32_1 = arith.constant 0 : i32
    return %c0_i32, %c0_i32_0 : i32, i32
  }
  func.func @transform_8(%arg0: i32) -> (i32, i32) {
    %c0_i32 = arith.constant 0 : i32
    %c0_i32_0 = arith.constant 0 : i32
    %c0_i32_1 = arith.constant 0 : i32
    return %c0_i32, %c0_i32_0 : i32, i32
  }
  func.func @transform_9(%arg0: i32) -> (i32, i32) {
    %c0_i32 = arith.constant 0 : i32
    %c0_i32_0 = arith.constant 0 : i32
    %c0_i32_1 = arith.constant 0 : i32
    return %c0_i32, %c0_i32_0 : i32, i32
  }
  func.func @transform_10(%arg0: i32) -> (i32, i32) {
    %c0_i32 = arith.constant 0 : i32
    %c0_i32_0 = arith.constant 0 : i32
    %c0_i32_1 = arith.constant 0 : i32
    return %c0_i32, %c0_i32_0 : i32, i32
  }
  func.func @transform_11(%arg0: i32) -> (i32, i32) {
    %c0_i32 = arith.constant 0 : i32
    %c0_i32_0 = arith.constant 0 : i32
    %c0_i32_1 = arith.constant 0 : i32
    return %c0_i32, %c0_i32_0 : i32, i32
  }
  func.func @transform_12(%arg0: i32) -> (i32, i32) {
    %c0_i32 = arith.constant 0 : i32
    %c0_i32_0 = arith.constant 0 : i32
    %c0_i32_1 = arith.constant 0 : i32
    return %c0_i32, %c0_i32_0 : i32, i32
  }
  func.func @transform_13(%arg0: i32) -> (i32, i32) {
    %c0_i32 = arith.constant 0 : i32
    %c0_i32_0 = arith.constant 0 : i32
    %c0_i32_1 = arith.constant 0 : i32
    return %c0_i32, %c0_i32_0 : i32, i32
  }
  func.func @transform_14(%arg0: i32) -> (i32, i32, i32) {
    %c0_i32 = arith.constant 0 : i32
    %c0_i32_0 = arith.constant 0 : i32
    %c0_i32_1 = arith.constant 0 : i32
    return %arg0, %c0_i32, %c0_i32_0 : i32, i32, i32
  }
  func.func @transform_15(%arg0: i32) -> (i32, i32, i32) {
    %c0_i32 = arith.constant 0 : i32
    %c0_i32_0 = arith.constant 0 : i32
    %c0_i32_1 = arith.constant 0 : i32
    return %arg0, %c0_i32, %c0_i32_0 : i32, i32, i32
  }
}

module attributes {stable_mosaic.version = 11 : i64} {
  func.func @_adaptive_attention_kernel(%arg0: i32, %arg1: memref<1xf32, #tpu.memory_space<smem>>, %arg2: memref<2x8x32xf32, #tpu.memory_space<vmem>>, %arg3: memref<8x4xf32, #tpu.memory_space<vmem>>, %arg4: memref<1x4xf32, #tpu.memory_space<vmem>>, %arg5: memref<4x8xf32, #tpu.memory_space<vmem>>, %arg6: memref<1x8xf32, #tpu.memory_space<vmem>>, %arg7: memref<32x16xf32, #tpu.memory_space<vmem>>, %arg8: memref<1x16xf32, #tpu.memory_space<vmem>>, %arg9: memref<16x32xf32, #tpu.memory_space<vmem>>, %arg10: memref<1x32xf32, #tpu.memory_space<vmem>>, %arg11: memref<32x64xf32, #tpu.memory_space<vmem>>, %arg12: memref<1x64xf32, #tpu.memory_space<vmem>>, %arg13: memref<64x32xf32, #tpu.memory_space<vmem>>, %arg14: memref<1x32xf32, #tpu.memory_space<vmem>>, %arg15: memref<2x8x32xf32, #tpu.memory_space<vmem>>, %arg16: memref<2x1x32xf32, #tpu.memory_space<vmem>>) attributes {dimension_semantics = [#tpu.dimension_semantics<parallel>], iteration_bounds = array<i64: 1>, scalar_prefetch = 0 : i64, scratch_operands = 0 : i64, tpu.core_type = #tpu.core_type<tc>, window_params = [{transform_indices = @transform_0, window_bounds = array<i64: 1>}, {transform_indices = @transform_1, window_bounds = array<i64: 2, 8, 32>}, {pipeline_mode = #tpu.pipeline_mode<synchronous>, transform_indices = @transform_2, window_bounds = array<i64: 8, 4>}, {pipeline_mode = #tpu.pipeline_mode<synchronous>, transform_indices = @transform_3, window_bounds = array<i64: 1, 4>}, {pipeline_mode = #tpu.pipeline_mode<synchronous>, transform_indices = @transform_4, window_bounds = array<i64: 4, 8>}, {pipeline_mode = #tpu.pipeline_mode<synchronous>, transform_indices = @transform_5, window_bounds = array<i64: 1, 8>}, {pipeline_mode = #tpu.pipeline_mode<synchronous>, transform_indices = @transform_6, window_bounds = array<i64: 32, 16>}, {pipeline_mode = #tpu.pipeline_mode<synchronous>, transform_indices = @transform_7, window_bounds = array<i64: 1, 16>}, {pipeline_mode = #tpu.pipeline_mode<synchronous>, transform_indices = @transform_8, window_bounds = array<i64: 16, 32>}, {pipeline_mode = #tpu.pipeline_mode<synchronous>, transform_indices = @transform_9, window_bounds = array<i64: 1, 32>}, {pipeline_mode = #tpu.pipeline_mode<synchronous>, transform_indices = @transform_10, window_bounds = array<i64: 32, 64>}, {pipeline_mode = #tpu.pipeline_mode<synchronous>, transform_indices = @transform_11, window_bounds = array<i64: 1, 64>}, {pipeline_mode = #tpu.pipeline_mode<synchronous>, transform_indices = @transform_12, window_bounds = array<i64: 64, 32>}, {pipeline_mode = #tpu.pipeline_mode<synchronous>, transform_indices = @transform_13, window_bounds = array<i64: 1, 32>}, {transform_indices = @transform_14, window_bounds = array<i64: 2, 8, 32>}, {transform_indices = @transform_15, window_bounds = array<i64: 2, 1, 32>}]} {
    %c0 = arith.constant 0 : index
    %c0_0 = arith.constant 0 : index
    %c0_1 = arith.constant 0 : index
    %0 = vector.load %arg2[%c0, %c0_0, %c0_1] : memref<2x8x32xf32, #tpu.memory_space<vmem>>, vector<2x8x32xf32>
    %cst = arith.constant dense<0.000000e+00> : vector<2x8xf32>
    %1 = vector.multi_reduction <add>, %0, %cst [2] : vector<2x8x32xf32> to vector<2x8xf32>
    %c0_2 = arith.constant 0 : index
    %c0_3 = arith.constant 0 : index
    %2 = vector.load %arg3[%c0_2, %c0_3] : memref<8x4xf32, #tpu.memory_space<vmem>>, vector<8x4xf32>
    %cst_4 = arith.constant dense<0.000000e+00> : vector<2x4xf32>
    %3 = tpu.matmul %1, %2, %cst_4 {dimension_numbers = #tpu.dot_dimension_numbers<[1], [0], [0], [1], [0, 0, 1, 1], [], []>} : vector<2x8xf32>, vector<8x4xf32>, vector<2x4xf32> -> vector<2x4xf32>
    %c0_5 = arith.constant 0 : index
    %c0_6 = arith.constant 0 : index
    %4 = vector.load %arg4[%c0_5, %c0_6] : memref<1x4xf32, #tpu.memory_space<vmem>>, vector<1x4xf32>
    %5 = vector.broadcast %4 : vector<1x4xf32> to vector<2x4xf32>
    %6 = arith.addf %3, %5 : vector<2x4xf32>
    %cst_7 = arith.constant 0.000000e+00 : f32
    %7 = vector.broadcast %cst_7 : f32 to vector<2x4xf32>
    %8 = arith.maximumf %6, %7 : vector<2x4xf32>
    %c0_8 = arith.constant 0 : index
    %c0_9 = arith.constant 0 : index
    %9 = vector.load %arg5[%c0_8, %c0_9] : memref<4x8xf32, #tpu.memory_space<vmem>>, vector<4x8xf32>
    %cst_10 = arith.constant dense<0.000000e+00> : vector<2x8xf32>
    %10 = tpu.matmul %8, %9, %cst_10 {dimension_numbers = #tpu.dot_dimension_numbers<[1], [0], [0], [1], [0, 0, 1, 1], [], []>} : vector<2x4xf32>, vector<4x8xf32>, vector<2x8xf32> -> vector<2x8xf32>
    %c0_11 = arith.constant 0 : index
    %c0_12 = arith.constant 0 : index
    %11 = vector.load %arg6[%c0_11, %c0_12] : memref<1x8xf32, #tpu.memory_space<vmem>>, vector<1x8xf32>
    %12 = vector.broadcast %11 : vector<1x8xf32> to vector<2x8xf32>
    %13 = arith.addf %10, %12 : vector<2x8xf32>
    %cst_13 = arith.constant dense<0xFF800000> : vector<2xf32>
    %14 = vector.multi_reduction <maximumf>, %13, %cst_13 [1] : vector<2x8xf32> to vector<2xf32>
    %15 = vector.shape_cast %14 : vector<2xf32> to vector<2x1xf32>
    %16 = vector.broadcast %15 : vector<2x1xf32> to vector<2x8xf32>
    %17 = arith.subf %13, %16 : vector<2x8xf32>
    %18 = math.exp %17 : vector<2x8xf32>
    %cst_14 = arith.constant dense<0.000000e+00> : vector<2xf32>
    %19 = vector.multi_reduction <add>, %18, %cst_14 [1] : vector<2x8xf32> to vector<2xf32>
    %20 = vector.shape_cast %19 : vector<2xf32> to vector<2x1xf32>
    %21 = tpu.reciprocal %20 : vector<2x1xf32> -> vector<2x1xf32>
    %22 = vector.broadcast %21 : vector<2x1xf32> to vector<2x8xf32>
    %23 = arith.mulf %18, %22 : vector<2x8xf32>
    %cst_15 = arith.constant dense<0.000000e+00> : vector<2x32xf32>
    %24 = vector.multi_reduction <add>, %0, %cst_15 [1] : vector<2x8x32xf32> to vector<2x32xf32>
    %c0_16 = arith.constant 0 : index
    %c0_17 = arith.constant 0 : index
    %25 = vector.load %arg7[%c0_16, %c0_17] : memref<32x16xf32, #tpu.memory_space<vmem>>, vector<32x16xf32>
    %cst_18 = arith.constant dense<0.000000e+00> : vector<2x16xf32>
    %26 = tpu.matmul %24, %25, %cst_18 {dimension_numbers = #tpu.dot_dimension_numbers<[1], [0], [0], [1], [0, 0, 1, 1], [], []>} : vector<2x32xf32>, vector<32x16xf32>, vector<2x16xf32> -> vector<2x16xf32>
    %c0_19 = arith.constant 0 : index
    %c0_20 = arith.constant 0 : index
    %27 = vector.load %arg8[%c0_19, %c0_20] : memref<1x16xf32, #tpu.memory_space<vmem>>, vector<1x16xf32>
    %28 = vector.broadcast %27 : vector<1x16xf32> to vector<2x16xf32>
    %29 = arith.addf %26, %28 : vector<2x16xf32>
    %cst_21 = arith.constant 0.000000e+00 : f32
    %30 = vector.broadcast %cst_21 : f32 to vector<2x16xf32>
    %31 = arith.maximumf %29, %30 : vector<2x16xf32>
    %c0_22 = arith.constant 0 : index
    %c0_23 = arith.constant 0 : index
    %32 = vector.load %arg9[%c0_22, %c0_23] : memref<16x32xf32, #tpu.memory_space<vmem>>, vector<16x32xf32>
    %cst_24 = arith.constant dense<0.000000e+00> : vector<2x32xf32>
    %33 = tpu.matmul %31, %32, %cst_24 {dimension_numbers = #tpu.dot_dimension_numbers<[1], [0], [0], [1], [0, 0, 1, 1], [], []>} : vector<2x16xf32>, vector<16x32xf32>, vector<2x32xf32> -> vector<2x32xf32>
    %c0_25 = arith.constant 0 : index
    %c0_26 = arith.constant 0 : index
    %34 = vector.load %arg10[%c0_25, %c0_26] : memref<1x32xf32, #tpu.memory_space<vmem>>, vector<1x32xf32>
    %35 = vector.broadcast %34 : vector<1x32xf32> to vector<2x32xf32>
    %36 = arith.addf %33, %35 : vector<2x32xf32>
    %37 = arith.negf %36 : vector<2x32xf32>
    %38 = math.exp %37 : vector<2x32xf32>
    %cst_27 = arith.constant 1.000000e+00 : f32
    %39 = vector.broadcast %cst_27 : f32 to vector<2x32xf32>
    %40 = arith.addf %39, %38 : vector<2x32xf32>
    %41 = arith.divf %39, %40 : vector<2x32xf32>
    %c0_28 = arith.constant 0 : index
    %42 = memref.load %arg1[%c0_28] : memref<1xf32, #tpu.memory_space<smem>>
    %43 = vector.broadcast %42 : f32 to vector<2x8xf32>
    %44 = arith.mulf %43, %23 : vector<2x8xf32>
    %45 = vector.shape_cast %44 : vector<2x8xf32> to vector<2x8x1xf32>
    %cst_29 = arith.constant 1.000000e+00 : f32
    %46 = arith.subf %cst_29, %42 : f32
    %47 = vector.broadcast %46 : f32 to vector<2x32xf32>
    %48 = arith.mulf %47, %41 : vector<2x32xf32>
    %49 = vector.shape_cast %48 : vector<2x32xf32> to vector<2x1x32xf32>
    %50 = vector.broadcast %45 : vector<2x8x1xf32> to vector<2x8x32xf32>
    %51 = vector.broadcast %49 : vector<2x1x32xf32> to vector<2x8x32xf32>
    %52 = arith.addf %50, %51 : vector<2x8x32xf32>
    %53 = arith.mulf %0, %52 : vector<2x8x32xf32>
    %c0_30 = arith.constant 0 : index
    %c0_31 = arith.constant 0 : index
    %c0_32 = arith.constant 0 : index
    %54 = vector.load %arg15[%c0_30, %c0_31, %c0_32] : memref<2x8x32xf32, #tpu.memory_space<vmem>>, vector<2x8x32xf32>
    tpu.vector_store %arg15[%c0_30, %c0_31, %c0_32], %53 {strides = array<i32>} : memref<2x8x32xf32, #tpu.memory_space<vmem>>, vector<2x8x32xf32>,
    %cst_33 = arith.constant dense<0.000000e+00> : vector<2x32xf32>
    %55 = vector.multi_reduction <add>, %53, %cst_33 [1] : vector<2x8x32xf32> to vector<2x32xf32>
    %c0_34 = arith.constant 0 : index
    %c0_35 = arith.constant 0 : index
    %56 = vector.load %arg11[%c0_34, %c0_35] : memref<32x64xf32, #tpu.memory_space<vmem>>, vector<32x64xf32>
    %cst_36 = arith.constant dense<0.000000e+00> : vector<2x64xf32>
    %57 = tpu.matmul %55, %56, %cst_36 {dimension_numbers = #tpu.dot_dimension_numbers<[1], [0], [0], [1], [0, 0, 1, 1], [], []>} : vector<2x32xf32>, vector<32x64xf32>, vector<2x64xf32> -> vector<2x64xf32>
    %c0_37 = arith.constant 0 : index
    %c0_38 = arith.constant 0 : index
    %58 = vector.load %arg12[%c0_37, %c0_38] : memref<1x64xf32, #tpu.memory_space<vmem>>, vector<1x64xf32>
    %59 = vector.broadcast %58 : vector<1x64xf32> to vector<2x64xf32>
    %60 = arith.addf %57, %59 : vector<2x64xf32>
    %cst_39 = arith.constant 0.000000e+00 : f32
    %61 = vector.broadcast %cst_39 : f32 to vector<2x64xf32>
    %62 = arith.maximumf %60, %61 : vector<2x64xf32>
    %c0_40 = arith.constant 0 : index
    %c0_41 = arith.constant 0 : index
    %63 = vector.load %arg13[%c0_40, %c0_41] : memref<64x32xf32, #tpu.memory_space<vmem>>, vector<64x32xf32>
    %cst_42 = arith.constant dense<0.000000e+00> : vector<2x32xf32>
    %64 = tpu.matmul %62, %63, %cst_42 {dimension_numbers = #tpu.dot_dimension_numbers<[1], [0], [0], [1], [0, 0, 1, 1], [], []>} : vector<2x64xf32>, vector<64x32xf32>, vector<2x32xf32> -> vector<2x32xf32>
    %c0_43 = arith.constant 0 : index
    %c0_44 = arith.constant 0 : index
    %65 = vector.load %arg14[%c0_43, %c0_44] : memref<1x32xf32, #tpu.memory_space<vmem>>, vector<1x32xf32>
    %66 = vector.broadcast %65 : vector<1x32xf32> to vector<2x32xf32>
    %67 = arith.addf %64, %66 : vector<2x32xf32>
    %cst_45 = arith.constant 0.000000e+00 : f32
    %68 = vector.broadcast %cst_45 : f32 to vector<2x32xf32>
    %69 = arith.maximumf %67, %68 : vector<2x32xf32>
    %70 = vector.shape_cast %69 : vector<2x32xf32> to vector<2x1x32xf32>
    %c0_46 = arith.constant 0 : index
    %c0_47 = arith.constant 0 : index
    %c0_48 = arith.constant 0 : index
    %71 = vector.load %arg16[%c0_46, %c0_47, %c0_48] : memref<2x1x32xf32, #tpu.memory_space<vmem>>, vector<2x1x32xf32>
    tpu.vector_store %arg16[%c0_46, %c0_47, %c0_48], %70 {strides = array<i32>} : memref<2x1x32xf32, #tpu.memory_space<vmem>>, vector<2x1x32xf32>,
    return
  }
  func.func @transform_0(%arg0: i32) -> i32 {
    %c0_i32 = arith.constant 0 : i32
    %c0_i32_0 = arith.constant 0 : i32
    return %c0_i32 : i32
  }
  func.func @transform_1(%arg0: i32) -> (i32, i32, i32) {
    %c0_i32 = arith.constant 0 : i32
    %c0_i32_0 = arith.constant 0 : i32
    %c0_i32_1 = arith.constant 0 : i32
    return %arg0, %c0_i32, %c0_i32_0 : i32, i32, i32
  }
  func.func @transform_2(%arg0: i32) -> (i32, i32) {
    %c0_i32 = arith.constant 0 : i32
    %c0_i32_0 = arith.constant 0 : i32
    %c0_i32_1 = arith.constant 0 : i32
    return %c0_i32, %c0_i32_0 : i32, i32
  }
  func.func @transform_3(%arg0: i32) -> (i32, i32) {
    %c0_i32 = arith.constant 0 : i32
    %c0_i32_0 = arith.constant 0 : i32
    %c0_i32_1 = arith.constant 0 : i32
    return %c0_i32, %c0_i32_0 : i32, i32
  }
  func.func @transform_4(%arg0: i32) -> (i32, i32) {
    %c0_i32 = arith.constant 0 : i32
    %c0_i32_0 = arith.constant 0 : i32
    %c0_i32_1 = arith.constant 0 : i32
    return %c0_i32, %c0_i32_0 : i32, i32
  }
  func.func @transform_5(%arg0: i32) -> (i32, i32) {
    %c0_i32 = arith.constant 0 : i32
    %c0_i32_0 = arith.constant 0 : i32
    %c0_i32_1 = arith.constant 0 : i32
    return %c0_i32, %c0_i32_0 : i32, i32
  }
  func.func @transform_6(%arg0: i32) -> (i32, i32) {
    %c0_i32 = arith.constant 0 : i32
    %c0_i32_0 = arith.constant 0 : i32
    %c0_i32_1 = arith.constant 0 : i32
    return %c0_i32, %c0_i32_0 : i32, i32
  }
  func.func @transform_7(%arg0: i32) -> (i32, i32) {
    %c0_i32 = arith.constant 0 : i32
    %c0_i32_0 = arith.constant 0 : i32
    %c0_i32_1 = arith.constant 0 : i32
    return %c0_i32, %c0_i32_0 : i32, i32
  }
  func.func @transform_8(%arg0: i32) -> (i32, i32) {
    %c0_i32 = arith.constant 0 : i32
    %c0_i32_0 = arith.constant 0 : i32
    %c0_i32_1 = arith.constant 0 : i32
    return %c0_i32, %c0_i32_0 : i32, i32
  }
  func.func @transform_9(%arg0: i32) -> (i32, i32) {
    %c0_i32 = arith.constant 0 : i32
    %c0_i32_0 = arith.constant 0 : i32
    %c0_i32_1 = arith.constant 0 : i32
    return %c0_i32, %c0_i32_0 : i32, i32
  }
  func.func @transform_10(%arg0: i32) -> (i32, i32) {
    %c0_i32 = arith.constant 0 : i32
    %c0_i32_0 = arith.constant 0 : i32
    %c0_i32_1 = arith.constant 0 : i32
    return %c0_i32, %c0_i32_0 : i32, i32
  }
  func.func @transform_11(%arg0: i32) -> (i32, i32) {
    %c0_i32 = arith.constant 0 : i32
    %c0_i32_0 = arith.constant 0 : i32
    %c0_i32_1 = arith.constant 0 : i32
    return %c0_i32, %c0_i32_0 : i32, i32
  }
  func.func @transform_12(%arg0: i32) -> (i32, i32) {
    %c0_i32 = arith.constant 0 : i32
    %c0_i32_0 = arith.constant 0 : i32
    %c0_i32_1 = arith.constant 0 : i32
    return %c0_i32, %c0_i32_0 : i32, i32
  }
  func.func @transform_13(%arg0: i32) -> (i32, i32) {
    %c0_i32 = arith.constant 0 : i32
    %c0_i32_0 = arith.constant 0 : i32
    %c0_i32_1 = arith.constant 0 : i32
    return %c0_i32, %c0_i32_0 : i32, i32
  }
  func.func @transform_14(%arg0: i32) -> (i32, i32, i32) {
    %c0_i32 = arith.constant 0 : i32
    %c0_i32_0 = arith.constant 0 : i32
    %c0_i32_1 = arith.constant 0 : i32
    return %arg0, %c0_i32, %c0_i32_0 : i32, i32, i32
  }
  func.func @transform_15(%arg0: i32) -> (i32, i32, i32) {
    %c0_i32 = arith.constant 0 : i32
    %c0_i32_0 = arith.constant 0 : i32
    %c0_i32_1 = arith.constant 0 : i32
    return %arg0, %c0_i32, %c0_i32_0 : i32, i32, i32
  }
}

</mosaic_0001>

<bundles_post_ra>
// kernel: tpu_custom_call.1
= control target key start
LH: loop header
LB: loop body
LE: loop exit
PB: predicated region body
PF: predicated region fallthrough
CT: control target
= control target key end

     0   :  { %22 = vsyncpa [#allocation4], 0  ;;  %vm54_vm0 = vcmask 261120   ;;  %s1469_s0 = inlined_call_operand.<no memory space> [shape: f32[1], index: 0, kind: input, shape index: {}]   ;;  %s1470_s1 = inlined_call_operand.vmem [shape: f32[2,8,32], index: 1, kind: input, shape index: {}]   ;;  %s1471_s2 = inlined_call_operand.vmem [shape: f32[8,4], index: 2, kind: input, shape index: {}]   ;;  %s1472_s3 = inlined_call_operand.vmem [shape: f32[1,4], index: 3, kind: input, shape index: {}]   ;;  %s1473_s4 = inlined_call_operand.vmem [shape: f32[4,8], index: 4, kind: input, shape index: {}]   ;;  %s1474_s5 = inlined_call_operand.vmem [shape: f32[1,8], index: 5, kind: input, shape index: {}]   ;;  %s1475_s6 = inlined_call_operand.vmem [shape: f32[32,16], index: 6, kind: input, shape index: {}]   ;;  %s1476_s7 = inlined_call_operand.vmem [shape: f32[1,16], index: 7, kind: input, shape index: {}]   ;;  %s1477_s8 = inlined_call_operand.vmem [shape: f32[16,32], index: 8, kind: input, shape index: {}]   ;;  %s1478_s9 = inlined_call_operand.vmem [shape: f32[1,32], index: 9, kind: input, shape index: {}]   ;;  %s1479_s10 = inlined_call_operand.vmem [shape: f32[32,64], index: 10, kind: input, shape index: {}]   ;;  %s1480_s11 = inlined_call_operand.vmem [shape: f32[1,64], index: 11, kind: input, shape index: {}]   ;;  %s1481_s12 = inlined_call_operand.vmem [shape: f32[64,32], index: 12, kind: input, shape index: {}]   ;;  %s1482_s13 = inlined_call_operand.vmem [shape: f32[1,32], index: 13, kind: input, shape index: {}]   ;;  %s1483_s14 = inlined_call_operand.hbm [shape: f32[2,1,256], index: 14, kind: output, shape index: {0}]   ;;  %s1484_s15 = inlined_call_operand.hbm [shape: f32[2,1,32], index: 15, kind: output, shape index: {1}]  }
   0x1   :  { %v1244_v0 = vld [vmem:[%s1470_s1] sm:$0xff]  ;;  %v1249_v1 = vld [vmem:[%s1470_s1 + $0x8] sm:$0xff] }
   0x2   :  { %v55_v2 = vsel %vm54_vm0, %v1244_v0, 0.0 }
   0x3   :  { %23 = vsyncpa [#allocation6], 0  ;;  %56 = vadd.xlane.f32.xlu0 %v55_v2  ;;  %v58_v3 = vsel %vm54_vm0, %v1249_v1, 0.0  ;;  %v61_v4 = vld [vmem:[%s1471_s2] sm:$0xff]  ;;  %v1147_v5 = vmov 0.0   ;;  %vm1148_vm1 = vmmov 0   ;;  %v71_v6 = vlaneseq }
   0x4   :  { %992 = vmatprep.subr.mxu0 %v1147_v5  ;;  %994 = vmatprep.mubr.msk.f32.mxu0 %vm1148_vm1, %v1147_v5  ;;  %vm81_vm2 = vcmask 1041409   ;;  %vm83_vm3 = vcmask 64512   ;;  %v255_v15 = vrot.slane %v55_v2, 4  ;;  %v261_v16 = vrot.slane %v58_v3, 4  ;;  %v157_v25 = vld [vmem:[%s1473_s4] sm:$0xf] }
   0x5   :  { %993 = vmatpush3.msra.mxu0 %v61_v4  ;;  %997 = vmatprep.subr.mxu1 %v1147_v5  ;;  %v72_v7 = vand.u32 127, %v71_v6  ;;  %v1266_v8 = vshrl.u32 %v71_v6, 7  ;;  %vm169_vm4 = vcmask 1043456   ;;  %v1149_v28 = vmov 0.0|0.0   ;;  %v952_v30 = vld [vmem:[%s1472_s3] ss:$0 sm:$0xff] }
   0x6   :  { %999 = vmatprep.mubr.msk.f32.mxu1 %vm1148_vm1, %v1147_v5  ;;  %v256_v17 = vadd.f32 %v255_v15, %v55_v2  ;;  %v262_v18 = vadd.f32 %v261_v16, %v58_v3  ;;  %998 = vmatpush3.msk.msra.mxu1 %vm169_vm4, %v157_v25  ;;  %v267_v31 = vld [vmem:[%s1475_s6] sm:$0xff]  ;;  %v268_v32 = vld [vmem:[%s1475_s6 + $0x8] sm:$0xff]  ;;  %vm165_vm5 = vcmask 31744   ;;  %v269_v38 = vld [vmem:[%s1475_s6 + $0x10] sm:$0xff]  ;;  %vm243_vm6 = vcmask 58368   ;;  %s460_s2 = ssub.f32 1.0, %s1469_s0 }
   0x7   :  { %59 = vadd.xlane.f32.xlu0 %v58_v3  ;;  %v75_v10 = vsub.s32 %v72_v7, %v1266_v8  ;;  %1050 = vmatprep.subr.bf16.mxu1 %v1149_v28  ;;  %v1051_v36 = vpack.c.bf16 %v268_v32, %v267_v31  ;;  %v270_v39 = vld [vmem:[%s1475_s6 + $0x18] sm:$0xff]  ;;  %v954_v41 = vld [vmem:[%s1474_s5] ss:$0 sm:$0xff]  ;;  %v355_v49 = vld [vmem:[%s1477_s8 + $0x8] sm:$0xff]  ;;  %vm363_vm7 = vcmask 130048   ;;  %v448_v15 = vsub.s32 0, %v1266_v8 }
   0x8   :  { %v257_v19 = vrot.slane %v256_v17, 2  ;;  %v263_v20 = vrot.slane %v262_v18, 2  ;;  %1065 = vmatprep.subr.bf16.mxu0 %v1149_v28  ;;  %v1054_v40 = vpack.c.bf16 %v270_v39, %v269_v38  ;;  %v957_v46 = vld [vmem:[%s1476_s7] ss:$0 sm:$0xff]  ;;  %v1150_v4 = vmov 1966171168  }
   0x9   :  { %v354_v48 = vld [vmem:[%s1477_s8] sm:$0xff]  ;;  %v465_v7 = vunpack.c.l.s4 %v1150_v4  ;;  %v455_v25 = vsub.s32 1, %v1266_v8  ;;  %v1152_v38 = vmov 1934713408   ;;  %s1154_s16 = smov 64   ;;  %s1155_s3 = smov 96  }
   0xa   :  { %v258_v21 = vadd.f32 %v257_v19, %v256_v17  ;;  %v264_v22 = vadd.f32 %v263_v20, %v262_v18  ;;  %v1057_v52 = vpack.c.bf16 %v355_v49, %v354_v48  ;;  %v959_v61 = vld [vmem:[%s1478_s9] ss:$0 sm:$0xff]  ;;  %v517_v39 = vunpack.c.l.s4 %v1152_v38  ;;  %s1156_s27 = smov [#allocation3]  }
   0xb   :  { %vm648_vm8 = vcmask 523264   ;;  %vm651_vm9 = vcmask 785408   ;;  %vm698_vm10 = vcmp.lt.s32.totalorder %v71_v6, 256  ;;  %s925_s4 = sshll.u32 %s1156_s27, 4  ;;  %s926_s4 = int_to_ptr.vmem [resolvable:$true] %s925_s4 }
   0xc   :  { %v259_v23 = vrot.slane %v258_v21, 1  ;;  %v265_v24 = vrot.slane %v264_v22, 1  ;;  %s1099_s28 = scalar_lea.vmem %s926_s4, 64  ;;  %p1104_p1 = scmp.lt.s32.totalorder %s926_s4, %s926_s4 }
   0xd   :  { %p1100_p0 = scmp.ne.s32.totalorder %s926_s4, %s1099_s28  ;;  %p1105_p2 = scmp.lt.s32.totalorder %s1099_s28, %s1099_s28 }
   0xe   :  { %v260_v26 = vadd.f32 %v259_v23, %v258_v21  ;;  %v266_v27 = vadd.f32 %v265_v24, %v264_v22  ;;  %v444_v23 = vstv %s1469_s0 }
   0xf   :  { %p1106_p3 = por %p1105_p2, %p1104_p1 }
  0x10   :  { %v280_v29 = vsel %vm81_vm2, %v266_v27, %v260_v26  ;;  %v716_v27 = vld [vmem:[%s1479_s10] sm:$0xff] }
  0x11   :  { %p1107_p4 = pnand %p1106_p3, %p1100_p0 }
  0x90   :  { %v57_v9 = vpop.xlane.xlu0 %56 }
  0x91   :  { %v76_v12 = vrot.slane %v57_v9, %v75_v10  ;;  %v466_v9 = vunpack.c.0.s8 %v465_v7 }
  0x94   :  { %v60_v11 = vpop.xlane.xlu0 %59 }
  0x95   :  { %v80_v13 = vrot.slane %v60_v11, %v75_v10  ;;  %v461_v11 = vstv %s460_s2 }
  0x97   :  { %v82_v14 = vsel %vm81_vm2, %v80_v13, %v76_v12  ;;  %v1324_v12 = vsub.s32 %v466_v9, %v1266_v8 }
  0x98   :  { %995 = vmatmul.mubr.msk.f32.vlgmr.msra.gmra.mrb[0].mxu0 %vm83_vm3, %v82_v14 }
  0x99   :  { %1047 = vmatprep.mubr.msk.f32.mxu0 %vm1148_vm1, %v1147_v5 }
 0x16b   :  { %v152_v33 = vpop.f32.mrb[0].mxu0 }
 0x16c   :  { %v153_v34 = vadd.f32 %v952_v30, %v152_v33  ;;  %v996_v35 = vpop.f32.mrb[1].mxu0  ;;  %v718_v33 = vld [vmem:[%s1479_s10 + $0x10] sm:$0xff] }
 0x16e   :  { %v156_v37 = vmax.f32 %v153_v34, 0.0  ;;  %v719_v34 = vld [vmem:[%s1479_s10 + $0x18] sm:$0xff] }
 0x16f   :  { %v1063_v35 = vpack.c.bf16 %v719_v34, %v718_v33  ;;  %v806_v33 = vld [vmem:[%s1481_s12 + $0x18] sm:$0xff] }
 0x170   :  { %1000 = vmatmul.mubr.msk.f32.vlgmr.msra.gmra.mrb[0].mxu1 %vm165_vm5, %v156_v37 }
 0x171   :  { %1052 = vmatpush3.bf16.msra.mxu1 %v1051_v36  ;;  %1010 = vmatprep.mubr.msk.f32.mxu1 %vm1148_vm1, %v1147_v5  ;;  %v1151_v36 = vmov 1983009808  }
 0x172   :  { %1053 = vmatprep.subr.bf16.mxu1 %v1149_v28  ;;  %v502_v37 = vunpack.c.l.s4 %v1151_v36  ;;  %v807_v36 = vld [vmem:[%s1481_s12 + $0x20] sm:$0xff] }
 0x175   :  { %1055 = vmatpush3.bf16.msra.mxu1 %v1054_v40  ;;  %v503_v40 = vunpack.c.0.s8 %v502_v37  ;;  %v808_v37 = vld [vmem:[%s1481_s12 + $0x28] sm:$0xff] }
 0x176   :  { %1056 = vmatprep.subr.bf16.mxu1 %v1149_v28 }
 0x178   :  { %1011 = vmatmul.mubr.msk.f32.vlgmr.msra.gmra.mrb[2].mxu1 %vm54_vm0, %v280_v29  ;;  %v717_v29 = vld [vmem:[%s1479_s10 + $0x8] sm:$0xff]  ;;  %s1153_s10 = smov 32  }
 0x179   :  { %1017 = vmatprep.mubr.msk.f32.mxu1 %vm1148_vm1, %v1147_v5  ;;  %1058 = vmatpush3.bf16.msra.mxu1 %v1057_v52  ;;  %v1060_v30 = vpack.c.bf16 %v717_v29, %v716_v27  ;;  %v803_v29 = vld [vmem:[%s1481_s12] sm:$0xff] }
 0x17a   :  { %1059 = vmatprep.subr.bf16.mxu1 %v1149_v28 }
 0x243   :  { %v239_v42 = vpop.f32.mrb[0].mxu1 }
 0x244   :  { %v240_v43 = vadd.f32 %v954_v41, %v239_v42  ;;  %v1001_v44 = vpop.f32.mrb[1].mxu1  ;;  %v518_v41 = vunpack.c.0.s8 %v517_v39  ;;  %v1072_v39 = vpack.c.bf16 %v808_v37, %v807_v36 }
 0x245   :  { %v506_v44 = vsub.s32 %v503_v40, %v1266_v8  ;;  %v809_v40 = vld [vmem:[%s1481_s12 + $0x30] sm:$0xff] }
 0x246   :  { %v244_v45 = vsel %vm243_vm6, %v240_v43, -inf  ;;  %v521_v49 = vsub.s32 %v518_v41, %v1266_v8  ;;  %v810_v41 = vld [vmem:[%s1481_s12 + $0x38] sm:$0xff] }
 0x247   :  { %245 = vmax.xlane.f32.xlu1 %v244_v45 }
 0x24b   :  { %v349_v47 = vpop.f32.mrb[2].mxu1 }
 0x24c   :  { %v350_v50 = vadd.f32 %v957_v46, %v349_v47  ;;  %v1012_v51 = vpop.f32.mrb[3].mxu1 }
 0x24e   :  { %v353_v53 = vmax.f32 %v350_v50, 0.0 }
 0x250   :  { %1018 = vmatmul.mubr.msk.f32.vlgmr.msra.gmra.mrb[4].mxu1 %vm363_vm7, %v353_v53 }
 0x251   :  { %1028 = vmatprep.mubr.msk.f32.mxu1 %vm1148_vm1, %v1147_v5  ;;  %1061 = vmatpush3.bf16.msra.mxu1 %v1060_v30  ;;  %v804_v30 = vld [vmem:[%s1481_s12 + $0x8] sm:$0xff] }
 0x252   :  { %1062 = vmatprep.subr.bf16.mxu1 %v1149_v28 }
 0x255   :  { %1064 = vmatpush3.bf16.msra.mxu1 %v1063_v35 }
 0x2d4   :  { %v246_v54 = vpop.xlane.xlu1 %245 }
 0x2d5   :  { %v247_v55 = vsub.f32 %v240_v43, %v246_v54 }
 0x2d7   :  { %v248_v56 = vmul.f32 1.442695, %v247_v55 }
 0x2d9   :  { %1091 = vpow2.f32 %v248_v56 }
 0x2e3   :  { %v1092_v57 = vpop.eup %1091 }
 0x2e4   :  { %v250_v58 = vsel %vm243_vm6, %v1092_v57, 0.0 }
 0x2e5   :  { %251 = vadd.xlane.f32.xlu1 %v250_v58 }
 0x323   :  { %v433_v59 = vpop.f32.mrb[4].mxu1 }
 0x324   :  { %v1019_v60 = vpop.f32.mrb[5].mxu1  ;;  %v434_v62 = vadd.f32 %v959_v61, %v433_v59 }
 0x326   :  { %v961_v63 = vmul.f32 -1.442695, %v434_v62 }
 0x328   :  { %1093 = vpow2.f32 %v961_v63 }
 0x332   :  { %v1094_v2 = vpop.eup %1093 }
 0x333   :  { %v440_v3 = vadd.f32 1.0, %v1094_v2 }
 0x335   :  { %1095 = vrcp.f32 %v440_v3 }
 0x33f   :  { %v1096_v10 = vpop.eup %1095 }
 0x340   :  { %v462_v13 = vmul.f32 %v1096_v10, %v461_v11 }
 0x342   :  { %v470_v14 = vrot.slane %v462_v13, %v1324_v12 }
 0x344   :  { %v471_v16 = vcombine.high %v470_v14, %v470_v14  ;;  %v478_v17 = vrot.slane %v470_v14, %v1324_v12 }
 0x346   :  { %v485_v19 = vrot.slane %v471_v16, %v1324_v12  ;;  %v489_v20 = vrot.slane %v478_v17, %v448_v15 }
 0x348   :  { %v493_v21 = vrot.slane %v485_v19, %v448_v15 }
 0x372   :  { %v252_v18 = vpop.xlane.xlu1 %251 }
 0x373   :  { %1097 = vrcp.f32 %v252_v18 }
 0x37d   :  { %v1098_v22 = vpop.eup %1097 }
 0x37e   :  { %v254_v24 = vmul.f32 %v1098_v22, %v1092_v57 }
 0x380   :  { %v445_v26 = vmul.f32 %v444_v23, %v254_v24 }
 0x382   :  { %v456_v31 = vrot.slane %v445_v26, %v455_v25  ;;  %v449_v32 = vrot.slane %v445_v26, %v448_v15 }
 0x384   :  { %458 = vbcast.lane.b32.xlu1 %v456_v31, 256  ;;  %451 = vbcast.lane.b32.xlu0 %v449_v32, 256  ;;  %v805_v31 = vld [vmem:[%s1481_s12 + $0x10] sm:$0xff]  ;;  %v1066_v32 = vpack.c.bf16 %v804_v30, %v803_v29 }
 0x385   :  { %v1069_v35 = vpack.c.bf16 %v806_v33, %v805_v31 }
 0x386   :  { %1067 = vmatpush3.bf16.msra.mxu0 %v1066_v32 }
 0x387   :  { %1068 = vmatprep.subr.bf16.mxu0 %v1149_v28 }
 0x38a   :  { %1070 = vmatpush3.bf16.msra.mxu0 %v1069_v35 }
 0x38b   :  { %1071 = vmatprep.subr.bf16.mxu0 %v1149_v28 }
 0x38e   :  { %1073 = vmatpush3.bf16.msra.mxu0 %v1072_v39 }
 0x38f   :  { %1074 = vmatprep.subr.bf16.mxu0 %v1149_v28 }
 0x3f6   :  { %v459_v42 = vpop.permute.xlu1 %458  ;;  %v452_v43 = vpop.permute.xlu0 %451 }
 0x3f7   :  { %v497_v45 = vadd.f32 %v493_v21, %v459_v42  ;;  %v496_v46 = vadd.f32 %v489_v20, %v452_v43  ;;  %v1075_v42 = vpack.c.bf16 %v810_v41, %v809_v40 }
 0x3f9   :  { %v499_v47 = vmul.f32 %v497_v45, %v1249_v1  ;;  %v498_v48 = vmul.f32 %v496_v46, %v1244_v0  ;;  %1076 = vmatpush3.bf16.msra.mxu0 %v1075_v42 }
 0x3fb   :  { %v556_v50 = vrot.slane %v499_v47, %v506_v44  ;;  %v709_v51 = vsel %vm54_vm0, %v499_v47, 0.0  ;;  %v500_v52 = vcombine.high %v498_v48, %v1147_v5  ;;  %v507_v54 = vrot.slane %v498_v48, %v506_v44 }
 0x3fc   :  { %v710_v53 = vrot.slane %v709_v51, 4  ;;  %v702_v55 = vsel %vm54_vm0, %v498_v48, 0.0  ;;  %v549_v2 = vcombine.high %v499_v47, %v1147_v5 }
 0x3fd   :  { %v703_v56 = vrot.slane %v702_v55, 4  ;;  %v514_v57 = vrot.slane %v500_v52, %v506_v44  ;;  %v1354_v59 = vrot.slane %v507_v54, %v521_v49  ;;  %v515_v1 = vcombine.high %v507_v54, %v1147_v5 }
 0x3fe   :  { %v711_v58 = vadd.f32 %v710_v53, %v709_v51  ;;  %v1357_v0 = vrot.slane %v556_v50, %v521_v49  ;;  %v564_v15 = vcombine.high %v556_v50, %v1147_v5  ;;  %v563_v16 = vrot.slane %v549_v2, %v506_v44 }
 0x3ff   :  { %v704_v60 = vadd.f32 %v703_v56, %v702_v55  ;;  %v545_v61 = vcombine.high %v1354_v59, %v1147_v5  ;;  %v529_v62 = vrot.slane %v515_v1, %v521_v49  ;;  %v1361_v63 = vrot.slane %v514_v57, %v521_v49 }
 0x400   :  { %v712_v8 = vrot.slane %v711_v58, 2  ;;  %v594_v11 = vcombine.high %v1357_v0, %v1147_v5  ;;  %v530_v13 = vcombine.high %v514_v57, %v1147_v5  ;;  %v578_v21 = vrot.slane %v564_v15, %v521_v49 }
 0x401   :  { %v705_v3 = vrot.slane %v704_v60, 2  ;;  %600 = vrot.lane.b32.xlu1 %v545_v61, %s1153_s10  ;;  %608 = vrot.lane.b32.xlu0 %v529_v62, %s1154_s16  ;;  %v547_v10 = vcombine.high %v1361_v63, %v1147_v5  ;;  %v586_v22 = vrot.slane %v563_v16, %v521_v49  ;;  %v546_v23 = vcombine.high %v529_v62, %v1147_v5 }
 0x402   :  { %v713_v4 = vadd.f32 %v712_v8, %v711_v58  ;;  %v544_v19 = vrot.slane %v530_v13, %v521_v49  ;;  %v579_v25 = vcombine.high %v563_v16, %v1147_v5  ;;  %v595_v34 = vcombine.high %v578_v21, %v1147_v5 }
 0x403   :  { %v706_v7 = vadd.f32 %v705_v3, %v704_v60  ;;  %v596_v24 = vcombine.high %v586_v22, %v1147_v5 }
 0x404   :  { %v714_v9 = vrot.slane %v713_v4, 1  ;;  %v548_v26 = vcombine.high %v544_v19, %v1147_v5  ;;  %v593_v27 = vrot.slane %v579_v25, %v521_v49 }
 0x405   :  { %v707_v14 = vrot.slane %v706_v7, 1  ;;  %624 = vrot.lane.b32.xlu0 %v547_v10, %s1153_s10  ;;  %602 = vrot.lane.b32.xlu1 %v594_v11, %s1153_s10 }
 0x406   :  { %v715_v17 = vadd.f32 %v714_v9, %v713_v4  ;;  %v597_v38 = vcombine.high %v593_v27, %v1147_v5 }
 0x407   :  { %v708_v18 = vadd.f32 %v707_v14, %v706_v7 }
 0x409   :  { %v729_v20 = vsel %vm81_vm2, %v715_v17, %v708_v18  ;;  %632 = vrot.lane.b32.xlu0 %v544_v19, %s1154_s16  ;;  %610 = vrot.lane.b32.xlu1 %v578_v21, %s1154_s16 }
 0x40a   :  { %1029 = vmatmul.mubr.msk.f32.vlgmr.msra.gmra.mrb[6].mxu1 %vm54_vm0, %v729_v20 }
 0x40d   :  { %616 = vrot.lane.b32.xlu0 %v546_v23, %s1155_s3  ;;  %626 = vrot.lane.b32.xlu1 %v596_v24, %s1153_s10 }
 0x411   :  { %640 = vrot.lane.b32.xlu0 %v548_v26, %s1155_s3  ;;  %634 = vrot.lane.b32.xlu1 %v593_v27, %s1154_s16 }
 0x415   :  { %618 = vrot.lane.b32.xlu1 %v595_v34, %s1155_s3 }
 0x419   :  { %642 = vrot.lane.b32.xlu1 %v597_v38, %s1155_s3 }
 0x473   :  { %v601_v43 = vpop.permute.xlu1 %600  ;;  %v609_v5 = vpop.permute.xlu0 %608 }
 0x474   :  { %v646_v28 = vsel %vm54_vm0, %v1354_v59, %v601_v43 }
 0x475   :  { %v649_v51 = vsel %vm648_vm8, %v646_v28, %v609_v5 }
 0x477   :  { %v625_v44 = vpop.permute.xlu0 %624  ;;  %v603_v45 = vpop.permute.xlu1 %602 }
 0x478   :  { %v654_v50 = vsel %vm54_vm0, %v1361_v63, %v625_v44  ;;  %v647_v60 = vsel %vm54_vm0, %v1357_v0, %v603_v45  ;;  %v962_v0 = vld [vmem:[%s1480_s11] ss:$0 sm:$0xff] }
 0x47b   :  { %v633_v46 = vpop.permute.xlu0 %632  ;;  %v611_v47 = vpop.permute.xlu1 %610 }
 0x47c   :  { %v656_v52 = vsel %vm648_vm8, %v654_v50, %v633_v46  ;;  %v650_v61 = vsel %vm648_vm8, %v647_v60, %v611_v47 }
 0x47f   :  { %v617_v48 = vpop.permute.xlu0 %616  ;;  %v627_v49 = vpop.permute.xlu1 %626 }
 0x480   :  { %v652_v54 = vsel %vm651_vm9, %v649_v51, %v617_v48  ;;  %v655_v8 = vsel %vm54_vm0, %v586_v22, %v627_v49 }
 0x483   :  { %v641_v53 = vpop.permute.xlu0 %640  ;;  %v635_v56 = vpop.permute.xlu1 %634 }
 0x484   :  { %v658_v55 = vsel %vm651_vm9, %v656_v52, %v641_v53  ;;  %v657_v62 = vsel %vm648_vm8, %v655_v8, %v635_v56 }
 0x485   :  { %v664_v57 = vcombine.low %v652_v54, %v658_v55 }
 0x487   :  { %v671_v58 = vrot.slane %v664_v57, %v1324_v12  ;;  %v619_v59 = vpop.permute.xlu1 %618 }
 0x488   :  { %v653_v2 = vsel %vm651_vm9, %v650_v61, %v619_v59 }
 0x489   :  { %v678_v1 = vrot.slane %v671_v58, %v1324_v12 }
 0x48b   :  { %700 = vst.msk [vmem:[#allocation3] sm:$0x3] %vm698_vm10, %v678_v1  ;;  %v643_v63 = vpop.permute.xlu1 %642 }
 0x48c   :  { %v659_v3 = vsel %vm651_vm9, %v657_v62, %v643_v63 }
 0x48d   :  { %v679_v4 = vcombine.low %v653_v2, %v659_v3 }
 0x48f   :  { %v686_v6 = vrot.slane %v679_v4, %v1324_v12 }
 0x491   :  { %v693_v7 = vrot.slane %v686_v6, %v1324_v12 }
 0x493   :  { %701 = vst.msk [vmem:[#allocation3 + $0x2] sm:$0x3] %vm698_vm10, %v693_v7 }
 0x4dd   :  { %v798_v9 = vpop.f32.mrb[6].mxu1 }
 0x4de   :  { %v799_v10 = vadd.f32 %v962_v0, %v798_v9  ;;  %v1030_v11 = vpop.f32.mrb[7].mxu1 }
 0x4e0   :  { %v802_v13 = vmax.f32 %v799_v10, 0.0 }
 0x4e2   :  { %1048 = vmatmul.mubr.msk.f32.vlgmr.msra.gmra.mrb[2].mxu0 %vm648_vm8, %v802_v13 }
 0x4e3   :  { %1110 = shalt.err (!%p1107_p4)
}
 0x4e4   :  { %s1111_s11 = scalar_lea.hbm %s1483_s14, 64 }
 0x4e5   :  { %p1112_p5 = scmp.ne.s32.totalorder %s1483_s14, %s1111_s11  ;;  %p1115_p6 = scmp.lt.u32.totalorder %s1111_s11, %s1483_s14 }
 0x4e7   :  { %p1117_p7 = pnand %p1115_p6, %p1112_p5 }
 0x4e9   :  { %1120 = shalt.err (!%p1117_p7)
}
 0x4ea   :  { %s1157_s18 = smov 2   ;;  %v964_v14 = vld [vmem:[%s1482_s13] ss:$0 sm:$0xff]  ;;  %s1158_s22 = smov [#allocation5]   ;;  %vm917_vm11 = vcmask 253952  }
 0x4eb   :  { %931 = dma.vmem_to_hbm [thread:$0]  %s926_s4, 64, %s1483_s14, [#allocation4], %s1153_s10, %s1153_s10, %s1157_s18  }
 0x4ec   :  { %s937_s23 = sshll.u32 %s1158_s22, 4  ;;  %s938_s23 = int_to_ptr.vmem [resolvable:$true] %s937_s23 }
 0x4ed   :  { %s1121_s14 = scalar_lea.vmem %s938_s23, 32  ;;  %p1126_p9 = scmp.lt.s32.totalorder %s938_s23, %s938_s23 }
 0x4ee   :  { %p1122_p8 = scmp.ne.s32.totalorder %s938_s23, %s1121_s14  ;;  %p1127_p10 = scmp.lt.s32.totalorder %s1121_s14, %s1121_s14 }
 0x4f0   :  { %p1128_p11 = por %p1127_p10, %p1126_p9 }
 0x4f2   :  { %p1129_p12 = pnand %p1128_p11, %p1122_p8 }
 0x5b5   :  { %v887_v15 = vpop.f32.mrb[2].mxu0 }
 0x5b6   :  { %v888_v16 = vadd.f32 %v964_v14, %v887_v15  ;;  %v1049_v17 = vpop.f32.mrb[3].mxu0 }
 0x5b8   :  { %v891_v18 = vmax.f32 %v888_v16, 0.0 }
 0x5ba   :  { %v899_v19 = vrot.slane %v891_v18, %v1324_v12 }
 0x5bc   :  { %v900_v20 = vcombine.high %v899_v19, %v899_v19  ;;  %v907_v21 = vrot.slane %v899_v19, %v1324_v12 }
 0x5be   :  { %v914_v22 = vrot.slane %v900_v20, %v1324_v12  ;;  %918 = vst.msk [vmem:[#allocation5] sm:$0x1] %vm917_vm11, %v907_v21 }
 0x5c0   :  { %919 = vst.msk [vmem:[#allocation5 + $0x1] sm:$0x1] %vm917_vm11, %v914_v22 }
 0x5c1   :  { %1132 = shalt.err (!%p1129_p12)
}
 0x5c2   :  { %s1133_s5 = scalar_lea.hbm %s1484_s15, 32 }
 0x5c3   :  { %p1134_p13 = scmp.ne.s32.totalorder %s1484_s15, %s1133_s5  ;;  %p1137_p0 = scmp.lt.u32.totalorder %s1133_s5, %s1484_s15 }
 0x5c5   :  { %p1139_p1 = pnand %p1137_p0, %p1134_p13 }
 0x5c7   :  { %1142 = shalt.err (!%p1139_p1)
}
 0x5c8   :  { %s1159_s9 = smov 16   ;;  %s1160_s24 = smov 1  }
 0x5c9   :  { %943 = dma.vmem_to_hbm [thread:$0]  %s938_s23, 32, %s1484_s15, [#allocation6], %s1159_s9, %s1159_s9, %s1160_s24  }
 0x5ca   :  { %1143 = dma.done.wait [#allocation4], 64  }
 0x5cb   :  { %1144 = vsyncadd [#allocation4], 4294967232 }
 0x5cc   :  { %1145 = dma.done.wait [#allocation6], 32  }
 0x5cd   :  { %1146 = vsyncadd [#allocation6], 4294967264 }
 0x5ce   :  { %950 = vsyncpa [#allocation4], 1 }
 0x5cf   :  { %951 = vsyncpa [#allocation6], 1 }

// kernel: tpu_custom_call.1
= control target key start
LH: loop header
LB: loop body
LE: loop exit
PB: predicated region body
PF: predicated region fallthrough
CT: control target
= control target key end

     0   :  { %22 = vsyncpa [#allocation4], 0  ;;  %vm54_vm0 = vcmask 261120   ;;  %s1206_s0 = inlined_call_operand.<no memory space> [shape: f32[1], index: 0, kind: input, shape index: {}]   ;;  %s1207_s1 = inlined_call_operand.vmem [shape: f32[2,8,32], index: 1, kind: input, shape index: {}]   ;;  %s1208_s2 = inlined_call_operand.vmem [shape: f32[8,4], index: 2, kind: input, shape index: {}]   ;;  %s1209_s3 = inlined_call_operand.vmem [shape: f32[1,4], index: 3, kind: input, shape index: {}]   ;;  %s1210_s4 = inlined_call_operand.vmem [shape: f32[4,8], index: 4, kind: input, shape index: {}]   ;;  %s1211_s5 = inlined_call_operand.vmem [shape: f32[1,8], index: 5, kind: input, shape index: {}]   ;;  %s1212_s6 = inlined_call_operand.vmem [shape: f32[32,16], index: 6, kind: input, shape index: {}]   ;;  %s1213_s7 = inlined_call_operand.vmem [shape: f32[1,16], index: 7, kind: input, shape index: {}]   ;;  %s1214_s8 = inlined_call_operand.vmem [shape: f32[16,32], index: 8, kind: input, shape index: {}]   ;;  %s1215_s9 = inlined_call_operand.vmem [shape: f32[1,32], index: 9, kind: input, shape index: {}]   ;;  %s1216_s10 = inlined_call_operand.vmem [shape: f32[32,64], index: 10, kind: input, shape index: {}]   ;;  %s1217_s11 = inlined_call_operand.vmem [shape: f32[1,64], index: 11, kind: input, shape index: {}]   ;;  %s1218_s12 = inlined_call_operand.vmem [shape: f32[64,32], index: 12, kind: input, shape index: {}]   ;;  %s1219_s13 = inlined_call_operand.vmem [shape: f32[1,32], index: 13, kind: input, shape index: {}]   ;;  %s1220_s14 = inlined_call_operand.hbm [shape: f32[2,8,32], index: 14, kind: output, shape index: {0}]   ;;  %s1221_s15 = inlined_call_operand.hbm [shape: f32[2,1,32], index: 15, kind: output, shape index: {1}]  }
   0x1   :  { %v1037_v0 = vld [vmem:[%s1207_s1] sm:$0xff]  ;;  %v1042_v1 = vld [vmem:[%s1207_s1 + $0x8] sm:$0xff] }
   0x2   :  { %v55_v2 = vsel %vm54_vm0, %v1037_v0, 0.0 }
   0x3   :  { %23 = vsyncpa [#allocation6], 0  ;;  %56 = vadd.xlane.f32.xlu0 %v55_v2  ;;  %v58_v3 = vsel %vm54_vm0, %v1042_v1, 0.0  ;;  %v61_v4 = vld [vmem:[%s1208_s2] sm:$0xff]  ;;  %v944_v5 = vmov 0.0   ;;  %vm945_vm1 = vmmov 0   ;;  %v71_v6 = vlaneseq }
   0x4   :  { %793 = vmatprep.subr.mxu0 %v944_v5  ;;  %795 = vmatprep.mubr.msk.f32.mxu0 %vm945_vm1, %v944_v5  ;;  %vm81_vm2 = vcmask 1041409   ;;  %vm83_vm3 = vcmask 64512   ;;  %v255_v15 = vrot.slane %v55_v2, 4  ;;  %v261_v16 = vrot.slane %v58_v3, 4  ;;  %v157_v25 = vld [vmem:[%s1210_s4] sm:$0xf] }
   0x5   :  { %794 = vmatpush3.msra.mxu0 %v61_v4  ;;  %798 = vmatprep.subr.mxu1 %v944_v5  ;;  %v72_v7 = vand.u32 127, %v71_v6  ;;  %v1057_v8 = vshrl.u32 %v71_v6, 7  ;;  %vm169_vm4 = vcmask 1043456   ;;  %v946_v28 = vmov 0.0|0.0   ;;  %v753_v30 = vld [vmem:[%s1209_s3] ss:$0 sm:$0xff] }
   0x6   :  { %800 = vmatprep.mubr.msk.f32.mxu1 %vm945_vm1, %v944_v5  ;;  %v256_v17 = vadd.f32 %v255_v15, %v55_v2  ;;  %v262_v18 = vadd.f32 %v261_v16, %v58_v3  ;;  %799 = vmatpush3.msk.msra.mxu1 %vm169_vm4, %v157_v25  ;;  %v267_v31 = vld [vmem:[%s1212_s6] sm:$0xff]  ;;  %v268_v32 = vld [vmem:[%s1212_s6 + $0x8] sm:$0xff]  ;;  %vm165_vm5 = vcmask 31744   ;;  %v269_v38 = vld [vmem:[%s1212_s6 + $0x10] sm:$0xff]  ;;  %vm243_vm6 = vcmask 58368   ;;  %s460_s2 = ssub.f32 1.0, %s1206_s0 }
   0x7   :  { %59 = vadd.xlane.f32.xlu0 %v58_v3  ;;  %v75_v10 = vsub.s32 %v72_v7, %v1057_v8  ;;  %851 = vmatprep.subr.bf16.mxu1 %v946_v28  ;;  %v852_v36 = vpack.c.bf16 %v268_v32, %v267_v31  ;;  %v270_v39 = vld [vmem:[%s1212_s6 + $0x18] sm:$0xff]  ;;  %v755_v41 = vld [vmem:[%s1211_s5] ss:$0 sm:$0xff]  ;;  %v355_v49 = vld [vmem:[%s1214_s8 + $0x8] sm:$0xff]  ;;  %vm363_vm7 = vcmask 130048   ;;  %vm618_vm8 = vcmask 523264  }
   0x8   :  { %v257_v19 = vrot.slane %v256_v17, 2  ;;  %v263_v20 = vrot.slane %v262_v18, 2  ;;  %866 = vmatprep.subr.bf16.mxu0 %v946_v28  ;;  %v855_v40 = vpack.c.bf16 %v270_v39, %v269_v38  ;;  %v758_v46 = vld [vmem:[%s1213_s7] ss:$0 sm:$0xff]  ;;  %v947_v4 = vmov 1966171168  }
   0x9   :  { %v354_v48 = vld [vmem:[%s1214_s8] sm:$0xff]  ;;  %v517_v25 = vld [vmem:[%s1216_s10 + $0x8] sm:$0xff]  ;;  %v518_v31 = vld [vmem:[%s1216_s10 + $0x10] sm:$0xff]  ;;  %s948_s25 = smov [#allocation3]  }
   0xa   :  { %v258_v21 = vadd.f32 %v257_v19, %v256_v17  ;;  %v264_v22 = vadd.f32 %v263_v20, %v262_v18  ;;  %v858_v52 = vpack.c.bf16 %v355_v49, %v354_v48  ;;  %v760_v61 = vld [vmem:[%s1215_s9] ss:$0 sm:$0xff]  ;;  %s726_s26 = sshll.u32 %s948_s25, 4  ;;  %s727_s26 = int_to_ptr.vmem [resolvable:$true] %s726_s26 }
   0xb   :  { %v607_v39 = vld [vmem:[%s1218_s12 + $0x20] sm:$0xff]  ;;  %s896_s27 = scalar_lea.vmem %s727_s26, 256  ;;  %p901_p1 = scmp.lt.s32.totalorder %s727_s26, %s727_s26 }
   0xc   :  { %v259_v23 = vrot.slane %v258_v21, 1  ;;  %v265_v24 = vrot.slane %v264_v22, 1  ;;  %p897_p0 = scmp.ne.s32.totalorder %s727_s26, %s896_s27  ;;  %p902_p2 = scmp.lt.s32.totalorder %s896_s27, %s896_s27 }
   0xe   :  { %v260_v26 = vadd.f32 %v259_v23, %v258_v21  ;;  %v266_v27 = vadd.f32 %v265_v24, %v264_v22  ;;  %v444_v21 = vstv %s1206_s0  ;;  %v455_v23 = vsub.s32 1, %v1057_v8  ;;  %v516_v24 = vld [vmem:[%s1216_s10] sm:$0xff]  ;;  %p903_p3 = por %p902_p2, %p901_p1 }
  0x10   :  { %v280_v29 = vsel %vm81_vm2, %v266_v27, %v260_v26  ;;  %v861_v27 = vpack.c.bf16 %v517_v25, %v516_v24  ;;  %p904_p4 = pnand %p903_p3, %p897_p0 }
  0x90   :  { %v57_v9 = vpop.xlane.xlu0 %56 }
  0x91   :  { %v76_v12 = vrot.slane %v57_v9, %v75_v10  ;;  %v461_v9 = vstv %s460_s2 }
  0x94   :  { %v60_v11 = vpop.xlane.xlu0 %59 }
  0x95   :  { %v80_v13 = vrot.slane %v60_v11, %v75_v10 }
  0x97   :  { %v82_v14 = vsel %vm81_vm2, %v80_v13, %v76_v12  ;;  %v448_v13 = vsub.s32 0, %v1057_v8 }
  0x98   :  { %796 = vmatmul.mubr.msk.f32.vlgmr.msra.gmra.mrb[0].mxu0 %vm83_vm3, %v82_v14 }
  0x99   :  { %848 = vmatprep.mubr.msk.f32.mxu0 %vm945_vm1, %v944_v5 }
 0x16b   :  { %v152_v33 = vpop.f32.mrb[0].mxu0 }
 0x16c   :  { %v153_v34 = vadd.f32 %v753_v30, %v152_v33  ;;  %v797_v35 = vpop.f32.mrb[1].mxu0  ;;  %v603_v33 = vld [vmem:[%s1218_s12] sm:$0xff] }
 0x16d   :  { %v605_v35 = vld [vmem:[%s1218_s12 + $0x10] sm:$0xff] }
 0x16e   :  { %v156_v37 = vmax.f32 %v153_v34, 0.0  ;;  %v604_v34 = vld [vmem:[%s1218_s12 + $0x8] sm:$0xff] }
 0x170   :  { %801 = vmatmul.mubr.msk.f32.vlgmr.msra.gmra.mrb[0].mxu1 %vm165_vm5, %v156_v37  ;;  %v606_v37 = vld [vmem:[%s1218_s12 + $0x18] sm:$0xff] }
 0x171   :  { %853 = vmatpush3.bf16.msra.mxu1 %v852_v36  ;;  %811 = vmatprep.mubr.msk.f32.mxu1 %vm945_vm1, %v944_v5  ;;  %v867_v36 = vpack.c.bf16 %v604_v34, %v603_v33  ;;  %v870_v38 = vpack.c.bf16 %v606_v37, %v605_v35 }
 0x172   :  { %854 = vmatprep.subr.bf16.mxu1 %v946_v28 }
 0x173   :  { %868 = vmatpush3.bf16.msra.mxu0 %v867_v36 }
 0x174   :  { %869 = vmatprep.subr.bf16.mxu0 %v946_v28 }
 0x175   :  { %856 = vmatpush3.bf16.msra.mxu1 %v855_v40  ;;  %v608_v40 = vld [vmem:[%s1218_s12 + $0x28] sm:$0xff] }
 0x176   :  { %857 = vmatprep.subr.bf16.mxu1 %v946_v28 }
 0x177   :  { %871 = vmatpush3.bf16.msra.mxu0 %v870_v38 }
 0x178   :  { %812 = vmatmul.mubr.msk.f32.vlgmr.msra.gmra.mrb[2].mxu1 %vm54_vm0, %v280_v29  ;;  %872 = vmatprep.subr.bf16.mxu0 %v946_v28 }
 0x179   :  { %818 = vmatprep.mubr.msk.f32.mxu1 %vm945_vm1, %v944_v5  ;;  %859 = vmatpush3.bf16.msra.mxu1 %v858_v52 }
 0x17a   :  { %860 = vmatprep.subr.bf16.mxu1 %v946_v28 }
 0x243   :  { %v239_v42 = vpop.f32.mrb[0].mxu1 }
 0x244   :  { %v240_v43 = vadd.f32 %v755_v41, %v239_v42  ;;  %v802_v44 = vpop.f32.mrb[1].mxu1  ;;  %v873_v41 = vpack.c.bf16 %v608_v40, %v607_v39 }
 0x246   :  { %v244_v45 = vsel %vm243_vm6, %v240_v43, -inf  ;;  %874 = vmatpush3.bf16.msra.mxu0 %v873_v41 }
 0x247   :  { %245 = vmax.xlane.f32.xlu1 %v244_v45  ;;  %875 = vmatprep.subr.bf16.mxu0 %v946_v28 }
 0x24b   :  { %v349_v47 = vpop.f32.mrb[2].mxu1 }
 0x24c   :  { %v350_v50 = vadd.f32 %v758_v46, %v349_v47  ;;  %v813_v51 = vpop.f32.mrb[3].mxu1 }
 0x24e   :  { %v353_v53 = vmax.f32 %v350_v50, 0.0 }
 0x250   :  { %819 = vmatmul.mubr.msk.f32.vlgmr.msra.gmra.mrb[4].mxu1 %vm363_vm7, %v353_v53 }
 0x251   :  { %829 = vmatprep.mubr.msk.f32.mxu1 %vm945_vm1, %v944_v5  ;;  %v465_v5 = vunpack.c.l.s4 %v947_v4  ;;  %862 = vmatpush3.bf16.msra.mxu1 %v861_v27 }
 0x252   :  { %863 = vmatprep.subr.bf16.mxu1 %v946_v28 }
 0x253   :  { %v466_v6 = vunpack.c.0.s8 %v465_v5 }
 0x255   :  { %v1115_v10 = vsub.s32 %v466_v6, %v1057_v8  ;;  %v519_v8 = vld [vmem:[%s1216_s10 + $0x18] sm:$0xff] }
 0x256   :  { %v864_v32 = vpack.c.bf16 %v519_v8, %v518_v31 }
 0x258   :  { %865 = vmatpush3.bf16.msra.mxu1 %v864_v32 }
 0x2d4   :  { %v246_v54 = vpop.xlane.xlu1 %245 }
 0x2d5   :  { %v247_v55 = vsub.f32 %v240_v43, %v246_v54 }
 0x2d7   :  { %v248_v56 = vmul.f32 1.442695, %v247_v55 }
 0x2d9   :  { %888 = vpow2.f32 %v248_v56 }
 0x2e3   :  { %v889_v57 = vpop.eup %888 }
 0x2e4   :  { %v250_v58 = vsel %vm243_vm6, %v889_v57, 0.0 }
 0x2e5   :  { %251 = vadd.xlane.f32.xlu1 %v250_v58 }
 0x323   :  { %v433_v59 = vpop.f32.mrb[4].mxu1 }
 0x324   :  { %v820_v60 = vpop.f32.mrb[5].mxu1  ;;  %v434_v62 = vadd.f32 %v760_v61, %v433_v59  ;;  %v610_v61 = vld [vmem:[%s1218_s12 + $0x38] sm:$0xff] }
 0x325   :  { %v609_v60 = vld [vmem:[%s1218_s12 + $0x30] sm:$0xff] }
 0x326   :  { %v762_v63 = vmul.f32 -1.442695, %v434_v62  ;;  %v876_v62 = vpack.c.bf16 %v610_v61, %v609_v60 }
 0x328   :  { %890 = vpow2.f32 %v762_v63  ;;  %877 = vmatpush3.bf16.msra.mxu0 %v876_v62  ;;  %v763_v63 = vld [vmem:[%s1217_s11] ss:$0 sm:$0xff] }
 0x332   :  { %v891_v2 = vpop.eup %890 }
 0x333   :  { %v440_v3 = vadd.f32 1.0, %v891_v2 }
 0x335   :  { %892 = vrcp.f32 %v440_v3 }
 0x33f   :  { %v893_v7 = vpop.eup %892 }
 0x340   :  { %v462_v11 = vmul.f32 %v893_v7, %v461_v9 }
 0x342   :  { %v470_v12 = vrot.slane %v462_v11, %v1115_v10 }
 0x344   :  { %v471_v14 = vcombine.high %v470_v12, %v470_v12  ;;  %v478_v15 = vrot.slane %v470_v12, %v1115_v10 }
 0x346   :  { %v485_v17 = vrot.slane %v471_v14, %v1115_v10  ;;  %v489_v18 = vrot.slane %v478_v15, %v448_v13 }
 0x348   :  { %v493_v19 = vrot.slane %v485_v17, %v448_v13 }
 0x372   :  { %v252_v16 = vpop.xlane.xlu1 %251 }
 0x373   :  { %894 = vrcp.f32 %v252_v16 }
 0x37d   :  { %v895_v20 = vpop.eup %894 }
 0x37e   :  { %v254_v22 = vmul.f32 %v895_v20, %v889_v57 }
 0x380   :  { %v445_v26 = vmul.f32 %v444_v21, %v254_v22 }
 0x382   :  { %v456_v29 = vrot.slane %v445_v26, %v455_v23  ;;  %v449_v30 = vrot.slane %v445_v26, %v448_v13 }
 0x384   :  { %458 = vbcast.lane.b32.xlu1 %v456_v29, 256  ;;  %451 = vbcast.lane.b32.xlu0 %v449_v30, 256 }
 0x3f6   :  { %v459_v42 = vpop.permute.xlu1 %458  ;;  %v452_v43 = vpop.permute.xlu0 %451 }
 0x3f7   :  { %v497_v44 = vadd.f32 %v493_v19, %v459_v42  ;;  %v496_v45 = vadd.f32 %v489_v18, %v452_v43 }
 0x3f9   :  { %v499_v46 = vmul.f32 %v497_v44, %v1042_v1  ;;  %v498_v47 = vmul.f32 %v496_v45, %v1037_v0 }
 0x3fb   :  { %501 = vst.msk [vmem:[#allocation3 + $0x8] sm:$0xff] %vm54_vm0, %v499_v46  ;;  %v509_v48 = vsel %vm54_vm0, %v499_v46, 0.0  ;;  %500 = vst.msk [vmem:[#allocation3] sm:$0xff] %vm54_vm0, %v498_v47  ;;  %v502_v49 = vsel %vm54_vm0, %v498_v47, 0.0 }
 0x3fc   :  { %v510_v50 = vrot.slane %v509_v48, 4  ;;  %v503_v51 = vrot.slane %v502_v49, 4 }
 0x3fe   :  { %v511_v52 = vadd.f32 %v510_v50, %v509_v48  ;;  %v504_v28 = vadd.f32 %v503_v51, %v502_v49 }
 0x400   :  { %v512_v53 = vrot.slane %v511_v52, 2  ;;  %v505_v54 = vrot.slane %v504_v28, 2 }
 0x402   :  { %v513_v55 = vadd.f32 %v512_v53, %v511_v52  ;;  %v506_v56 = vadd.f32 %v505_v54, %v504_v28 }
 0x404   :  { %v514_v57 = vrot.slane %v513_v55, 1  ;;  %v507_v1 = vrot.slane %v506_v56, 1 }
 0x406   :  { %v515_v58 = vadd.f32 %v514_v57, %v513_v55  ;;  %v508_v0 = vadd.f32 %v507_v1, %v506_v56 }
 0x408   :  { %v529_v59 = vsel %vm81_vm2, %v515_v58, %v508_v0 }
 0x409   :  { %830 = vmatmul.mubr.msk.f32.vlgmr.msra.gmra.mrb[6].mxu1 %vm54_vm0, %v529_v59 }
 0x4dc   :  { %v598_v2 = vpop.f32.mrb[6].mxu1 }
 0x4dd   :  { %v599_v3 = vadd.f32 %v763_v63, %v598_v2  ;;  %v831_v4 = vpop.f32.mrb[7].mxu1 }
 0x4df   :  { %v602_v5 = vmax.f32 %v599_v3, 0.0 }
 0x4e1   :  { %849 = vmatmul.mubr.msk.f32.vlgmr.msra.gmra.mrb[2].mxu0 %vm618_vm8, %v602_v5 }
 0x4e2   :  { %907 = shalt.err (!%p904_p4)
}
 0x4e3   :  { %s908_s11 = scalar_lea.hbm %s1220_s14, 256 }
 0x4e4   :  { %p909_p5 = scmp.ne.s32.totalorder %s1220_s14, %s908_s11  ;;  %p912_p6 = scmp.lt.u32.totalorder %s908_s11, %s1220_s14 }
 0x4e6   :  { %p914_p7 = pnand %p912_p6, %p909_p5 }
 0x4e8   :  { %917 = shalt.err (!%p914_p7)
}
 0x4e9   :  { %s949_s16 = smov 128   ;;  %s950_s3 = smov 8   ;;  %v765_v6 = vld [vmem:[%s1219_s13] ss:$0 sm:$0xff]  ;;  %vm718_vm9 = vcmask 253952  }
 0x4ea   :  { %732 = dma.vmem_to_hbm [thread:$0]  %s727_s26, 256, %s1220_s14, [#allocation4], %s949_s16, %s949_s16, %s950_s3  }
 0x4eb   :  { %s951_s20 = smov [#allocation5]  }
 0x4ec   :  { %s738_s21 = sshll.u32 %s951_s20, 4  ;;  %s739_s21 = int_to_ptr.vmem [resolvable:$true] %s738_s21 }
 0x4ed   :  { %s918_s14 = scalar_lea.vmem %s739_s21, 32  ;;  %p923_p9 = scmp.lt.s32.totalorder %s739_s21, %s739_s21 }
 0x4ee   :  { %p919_p8 = scmp.ne.s32.totalorder %s739_s21, %s918_s14  ;;  %p924_p10 = scmp.lt.s32.totalorder %s918_s14, %s918_s14 }
 0x4f0   :  { %p925_p11 = por %p924_p10, %p923_p9 }
 0x4f2   :  { %p926_p12 = pnand %p925_p11, %p919_p8 }
 0x5b4   :  { %v688_v7 = vpop.f32.mrb[2].mxu0 }
 0x5b5   :  { %v689_v9 = vadd.f32 %v765_v6, %v688_v7  ;;  %v850_v11 = vpop.f32.mrb[3].mxu0 }
 0x5b7   :  { %v692_v12 = vmax.f32 %v689_v9, 0.0 }
 0x5b9   :  { %v700_v13 = vrot.slane %v692_v12, %v1115_v10 }
 0x5bb   :  { %v701_v14 = vcombine.high %v700_v13, %v700_v13  ;;  %v708_v15 = vrot.slane %v700_v13, %v1115_v10 }
 0x5bd   :  { %v715_v16 = vrot.slane %v701_v14, %v1115_v10  ;;  %719 = vst.msk [vmem:[#allocation5] sm:$0x1] %vm718_vm9, %v708_v15 }
 0x5bf   :  { %720 = vst.msk [vmem:[#allocation5 + $0x1] sm:$0x1] %vm718_vm9, %v715_v16 }
 0x5c0   :  { %929 = shalt.err (!%p926_p12)
}
 0x5c1   :  { %s930_s22 = scalar_lea.hbm %s1221_s15, 32 }
 0x5c2   :  { %p931_p13 = scmp.ne.s32.totalorder %s1221_s15, %s930_s22  ;;  %p934_p0 = scmp.lt.u32.totalorder %s930_s22, %s1221_s15 }
 0x5c4   :  { %p936_p1 = pnand %p934_p0, %p931_p13 }
 0x5c6   :  { %939 = shalt.err (!%p936_p1)
}
 0x5c7   :  { %s952_s1 = smov 16   ;;  %s953_s2 = smov 1  }
 0x5c8   :  { %744 = dma.vmem_to_hbm [thread:$0]  %s739_s21, 32, %s1221_s15, [#allocation6], %s952_s1, %s952_s1, %s953_s2  }
 0x5c9   :  { %940 = dma.done.wait [#allocation4], 256  }
 0x5ca   :  { %941 = vsyncadd [#allocation4], 4294967040 }
 0x5cb   :  { %942 = dma.done.wait [#allocation6], 32  }
 0x5cc   :  { %943 = vsyncadd [#allocation6], 4294967264 }
 0x5cd   :  { %751 = vsyncpa [#allocation4], 1 }
 0x5ce   :  { %752 = vsyncpa [#allocation6], 1 }

</bundles_post_ra>
